<compile_context>
chip_gen: v6e
topology: v6e:2x2x1
jax: 0.10.0
libtpu: 0.0.40
codegen_flags: <defaults>
</compile_context>

<pallas_src>
import functools
import math

import jax
import jax.numpy as jnp
from jax import lax
from jax.experimental import pallas as pl
from jax.experimental.pallas import tpu as pltpu

EPS = 1e-5  # nn.BatchNorm2d default eps


def fused_kernel(x_ref, wp_ref, wl_ref, bc_ref, g_ref, be_ref,
                 w1_ref, b1_ref, w2_ref, b2_ref,
                 comb_ref,
                 conv_sc, s1_sc, s2_sc, *, b_true):
    # x_ref:    [bt, 10, 10, 128] bf16   zero-padded NHWC input tile
    # wp_ref:   [4, 256, 32]      bf16   conv taps (2t, 2t+1) stacked along K
    # wl_ref:   [128, 32]         bf16   conv tap 8
    # bc_ref, g_ref, be_ref: [1, 32] f32 conv bias, BN gamma, BN beta
    # w1_ref:   [512, 64] bf16; b1_ref [1,64]; w2_ref [1,64]; b2_ref [1,1] f32
    # comb_ref: [b_pad, 128] f32  cols 0:64 = hidden, cols 64:128 = broadcast out
    # conv_sc:  [b_pad*8, 256] f32 lane-dense conv scratch (row = b*8+h, col = w*32+c)
    # s1_sc, s2_sc: [1, 32] f32   running BN sum / sum-of-squares
    i = pl.program_id(0)
    bt = x_ref.shape[0]
    m = bt * 64
    rows_per_tile = bt * 8
    n_tiles = conv_sc.shape[0] // rows_per_tile
    b_pad = n_tiles * bt

    # ---- 3x3 conv for this batch tile (spatial padding already applied) ----
    xt = x_ref[...]                                        # [bt,10,10,128] bf16
    wp = wp_ref[...]                                       # [4,256,32] bf16
    wl = wl_ref[...]                                       # [128,32] bf16

    def tap_rows(t):                                       # shifted window -> [m,128]
        kh, kw = divmod(t, 3)
        return xt[:, kh:kh + 8, kw:kw + 8, :].reshape(m, 128)

    acc = jnp.zeros((m, 32), jnp.float32)
    for t in range(4):                                     # K=256 tap pairs (MXU depth)
        rows = jnp.concatenate([tap_rows(2 * t), tap_rows(2 * t + 1)], axis=1)
        acc = acc + jnp.dot(rows, wp[t], preferred_element_type=jnp.float32)
    acc = acc + jnp.dot(tap_rows(8), wl, preferred_element_type=jnp.float32)
    conv = acc + bc_ref[...]                               # [m,32] f32, rows=(b,h,w)

    # ---- BN partial statistics (exclude batch-padding rows) ----
    if b_true == b_pad:
        s1 = jnp.sum(conv, axis=0, keepdims=True)
        s2 = jnp.sum(conv * conv, axis=0, keepdims=True)
    else:
        samp = i * bt + lax.broadcasted_iota(jnp.int32, (m, 1), 0) // 64
        msk = (samp < b_true).astype(jnp.float32)
        s1 = jnp.sum(conv * msk, axis=0, keepdims=True)
        s2 = jnp.sum(conv * conv * msk, axis=0, keepdims=True)

    @pl.when(i == 0)
    def _():
        s1_sc[...] = jnp.zeros_like(s1_sc)
        s2_sc[...] = jnp.zeros_like(s2_sc)

    s1_sc[...] += s1
    s2_sc[...] += s2

    # ---- write this tile's conv result into the lane-dense VMEM scratch ----
    conv4 = conv.reshape(bt, 8, 8, 32)                     # (b, h, w, c)
    conv256 = jnp.concatenate(
        [conv4[:, :, w, :].reshape(rows_per_tile, 32) for w in range(8)], axis=1)
    row0 = pl.multiple_of(i * rows_per_tile, 8)
    conv_sc[pl.ds(row0, rows_per_tile), :] = conv256       # full-lane (256) store

    # ---- final step: BN affine + ReLU + 2x2 maxpool + MLP for the whole batch ----
    @pl.when(i == n_tiles - 1)
    def _():
        cnt = jnp.float32(b_true * 64)
        mean = s1_sc[...] / cnt                            # [1,32]
        var = jnp.maximum(s2_sc[...] / cnt - mean * mean, 0.0)   # biased (training BN)
        a = g_ref[...] * lax.rsqrt(var + EPS)
        d = be_ref[...] - mean * a
        a256 = jnp.concatenate([a] * 8, axis=1)            # broadcast over w groups
        d256 = jnp.concatenate([d] * 8, axis=1)
        w1 = w1_ref[...]                                   # [512,64] bf16
        b1 = b1_ref[...]
        w2 = w2_ref[...]
        b2 = b2_ref[...]
        for j in range(n_tiles):                           # static unrolled loop
            y = conv_sc[pl.ds(j * rows_per_tile, rows_per_tile), :]   # [bt*8,256]
            y = jnp.maximum(y * a256 + d256, 0.0)          # BN affine + ReLU
            y3 = y.reshape(bt, 8, 256)
            pieces = []
            for ph in range(4):
                r = jnp.maximum(y3[:, 2 * ph, :], y3[:, 2 * ph + 1, :])   # pool h
                for pw in range(4):                        # pool w (32-lane groups)
                    lo = (2 * pw) * 32
                    pieces.append(jnp.maximum(r[:, lo:lo + 32], r[:, lo + 32:lo + 64]))
            pooled = jnp.concatenate(pieces, axis=1)       # [bt,512] order (ph,pw,c)
            hid = jnp.maximum(
                jnp.dot(pooled.astype(jnp.bfloat16), w1,
                        preferred_element_type=jnp.float32) + b1, 0.0)    # [bt,64]
            out = jnp.sum(hid * w2, axis=1, keepdims=True) + b2           # [bt,1]
            comb_ref[pl.ds(j * bt, bt), :] = jnp.concatenate(
                [hid, jnp.broadcast_to(out, (bt, 64))], axis=1)


def dot_classification_forward(x, params, *, max_tile=32):
    """x: NCHW float32 [B, 128, 8, 8] -> (outputs [B,1], hidden [B,64])."""
    B = x.shape[0]
    assert x.shape[1:] == (128, 8, 8), "module implies a 128x8x8 input"
    bt = min(B, max_tile)
    n_bt = -(-B // bt)                                     # cdiv
    b_pad = n_bt * bt

    # glue: NHWC, pad batch to tile multiple + spatial by 1, bf16 for the MXU
    xh = jnp.transpose(x, (0, 2, 3, 1))                                 # [B,8,8,128]
    xpad = jnp.pad(xh, ((0, b_pad - B), (1, 1), (1, 1), (0, 0))).astype(jnp.bfloat16)

    wc = (jnp.transpose(params["Wc"], (2, 3, 1, 0))                     # (kh,kw,ci,co)
             .reshape(9, 128, 32).astype(jnp.bfloat16))
    wpair = wc[:8].reshape(4, 256, 32)                                  # K-stacked pairs
    wlast = wc[8]                                                       # [128,32]
    bc = params["bc"].reshape(1, 32).astype(jnp.float32)
    gamma = params["gamma"].reshape(1, 32).astype(jnp.float32)
    beta = params["beta"].reshape(1, 32).astype(jnp.float32)
    # PyTorch flatten order of pooled [B,32,4,4] is c*16+ph*4+pw; kernel builds
    # (ph,pw,c) = ph*128+pw*32+c, so permute W1 host-side (free) to match.
    w1 = (params["W1"].reshape(64, 32, 4, 4).transpose(2, 3, 1, 0)
                     .reshape(512, 64).astype(jnp.bfloat16))
    b1 = params["b1"].reshape(1, 64).astype(jnp.float32)
    w2 = params["W2"].reshape(1, 64).astype(jnp.float32)
    b2 = params["b2"].reshape(1, 1).astype(jnp.float32)

    comb = pl.pallas_call(
        functools.partial(fused_kernel, b_true=B),
        out_shape=jax.ShapeDtypeStruct((b_pad, 128), jnp.float32),
        grid=(n_bt,),
        in_specs=[
            pl.BlockSpec((bt, 10, 10, 128), lambda i: (i, 0, 0, 0)),
            pl.BlockSpec((4, 256, 32), lambda i: (0, 0, 0)),
            pl.BlockSpec((128, 32), lambda i: (0, 0)),
            pl.BlockSpec((1, 32), lambda i: (0, 0)),
            pl.BlockSpec((1, 32), lambda i: (0, 0)),
            pl.BlockSpec((1, 32), lambda i: (0, 0)),
            pl.BlockSpec((512, 64), lambda i: (0, 0)),
            pl.BlockSpec((1, 64), lambda i: (0, 0)),
            pl.BlockSpec((1, 64), lambda i: (0, 0)),
            pl.BlockSpec((1, 1), lambda i: (0, 0)),
        ],
        out_specs=pl.BlockSpec((b_pad, 128), lambda i: (0, 0)),
        scratch_shapes=[
            pltpu.VMEM((b_pad * 8, 256), jnp.float32),     # whole-batch conv scratch
            pltpu.VMEM((1, 32), jnp.float32),              # BN sum
            pltpu.VMEM((1, 32), jnp.float32),              # BN sum of squares
        ],
        compiler_params=pltpu.CompilerParams(
            dimension_semantics=("arbitrary",),            # sequential stat accumulate
            vmem_limit_bytes=32 * 1024 * 1024),
    )(xpad, wpair, wlast, bc, gamma, beta, w1, b1, w2, b2)

    hid = comb[:B, :64]
    out = comb[:B, 64:65]
    return out, hid


def ref_forward(x, p):
    """Plain-JAX reference reproducing the PyTorch forward (training-mode BN)."""
    conv = lax.conv_general_dilated(
        x, p["Wc"], window_strides=(1, 1), padding=((1, 1), (1, 1)),
        dimension_numbers=("NCHW", "OIHW", "NCHW")) + p["bc"][None, :, None, None]
    mean = conv.mean(axis=(0, 2, 3), keepdims=True)
    var = ((conv - mean) ** 2).mean(axis=(0, 2, 3), keepdims=True)
    bn = ((conv - mean) / jnp.sqrt(var + EPS) * p["gamma"][None, :, None, None]
          + p["beta"][None, :, None, None])
    r = jnp.maximum(bn, 0.0)
    B = x.shape[0]
    pooled = r.reshape(B, 32, 4, 2, 4, 2).max(axis=(3, 5))               # MaxPool2d(2,2)
    flat = pooled.reshape(B, -1)                                         # [B,512] (c,h,w)
    hid = jnp.maximum(flat @ p["W1"].T + p["b1"], 0.0)
    out = hid @ p["W2"].T + p["b2"]
    return out, hid


def build_params(key):
    ks = jax.random.split(key, 6)
    return {
        "Wc": jax.random.normal(ks[0], (32, 128, 3, 3), jnp.float32) / math.sqrt(128 * 9),
        "bc": jax.random.normal(ks[1], (32,), jnp.float32) * 0.05,
        "gamma": jnp.ones((32,), jnp.float32),
        "beta": jnp.zeros((32,), jnp.float32),
        "W1": jax.random.normal(ks[2], (64, 512), jnp.float32) / math.sqrt(512),
        "b1": jax.random.normal(ks[3], (64,), jnp.float32) * 0.05,
        "W2": jax.random.normal(ks[4], (1, 64), jnp.float32) / math.sqrt(64),
        "b2": jax.random.normal(ks[5], (1,), jnp.float32) * 0.05,
    }


if __name__ == "__main__":
    key = jax.random.PRNGKey(0)
    kx, kp = jax.random.split(key)
    x = jax.random.normal(kx, (2, 128, 8, 8), jnp.float32)               # NCHW, like PyTorch
    params = build_params(kp)

    out, hid = jax.jit(dot_classification_forward)(x, params)
    jax.block_until_ready((out, hid))

    out_ref, hid_ref = ref_forward(x, params)
    assert out.shape == (2, 1) and hid.shape == (2, 64)
    # bf16 MXU operands (f32 accumulation) -> slightly looser tolerance than pure f32.
    assert bool(jnp.allclose(out, out_ref, rtol=2e-2, atol=2e-2)), "outputs mismatch"
    assert bool(jnp.allclose(hid, hid_ref, rtol=2e-2, atol=2e-2)), "hidden mismatch"

    print("KERNEL_OK")
</pallas_src>

<mosaic_0001>
module attributes {stable_mosaic.version = 11 : i64} {
  func.func @fused_kernel(%arg0: i32, %arg1: memref<2x10x10x128xbf16, #tpu.memory_space<vmem>>, %arg2: memref<4x256x32xbf16, #tpu.memory_space<vmem>>, %arg3: memref<128x32xbf16, #tpu.memory_space<vmem>>, %arg4: memref<1x32xf32, #tpu.memory_space<vmem>>, %arg5: memref<1x32xf32, #tpu.memory_space<vmem>>, %arg6: memref<1x32xf32, #tpu.memory_space<vmem>>, %arg7: memref<512x64xbf16, #tpu.memory_space<vmem>>, %arg8: memref<1x64xf32, #tpu.memory_space<vmem>>, %arg9: memref<1x64xf32, #tpu.memory_space<vmem>>, %arg10: memref<1x1xf32, #tpu.memory_space<vmem>>, %arg11: memref<2x128xf32, #tpu.memory_space<vmem>>, %arg12: memref<16x256xf32, #tpu.memory_space<vmem>>, %arg13: memref<1x32xf32, #tpu.memory_space<vmem>>, %arg14: memref<1x32xf32, #tpu.memory_space<vmem>>) attributes {dimension_semantics = [#tpu.dimension_semantics<arbitrary>], iteration_bounds = array<i64: 1>, scalar_prefetch = 0 : i64, scratch_operands = 3 : i64, tpu.core_type = #tpu.core_type<tc>, window_params = [{transform_indices = @transform_0, window_bounds = array<i64: 2, 10, 10, 128>}, {pipeline_mode = #tpu.pipeline_mode<synchronous>, transform_indices = @transform_1, window_bounds = array<i64: 4, 256, 32>}, {pipeline_mode = #tpu.pipeline_mode<synchronous>, transform_indices = @transform_2, window_bounds = array<i64: 128, 32>}, {pipeline_mode = #tpu.pipeline_mode<synchronous>, transform_indices = @transform_3, window_bounds = array<i64: 1, 32>}, {pipeline_mode = #tpu.pipeline_mode<synchronous>, transform_indices = @transform_4, window_bounds = array<i64: 1, 32>}, {pipeline_mode = #tpu.pipeline_mode<synchronous>, transform_indices = @transform_5, window_bounds = array<i64: 1, 32>}, {pipeline_mode = #tpu.pipeline_mode<synchronous>, transform_indices = @transform_6, window_bounds = array<i64: 512, 64>}, {pipeline_mode = #tpu.pipeline_mode<synchronous>, transform_indices = @transform_7, window_bounds = array<i64: 1, 64>}, {pipeline_mode = #tpu.pipeline_mode<synchronous>, transform_indices = @transform_8, window_bounds = array<i64: 1, 64>}, {pipeline_mode = #tpu.pipeline_mode<synchronous>, transform_indices = @transform_9, window_bounds = array<i64: 1, 1>}, {pipeline_mode = #tpu.pipeline_mode<synchronous>, transform_indices = @transform_10, window_bounds = array<i64: 2, 128>}]} {
    %c0 = arith.constant 0 : index
    %c0_0 = arith.constant 0 : index
    %c0_1 = arith.constant 0 : index
    %c0_2 = arith.constant 0 : index
    %0 = vector.load %arg1[%c0, %c0_0, %c0_1, %c0_2] : memref<2x10x10x128xbf16, #tpu.memory_space<vmem>>, vector<2x10x10x128xbf16>
    %c0_3 = arith.constant 0 : index
    %c0_4 = arith.constant 0 : index
    %c0_5 = arith.constant 0 : index
    %1 = vector.load %arg2[%c0_3, %c0_4, %c0_5] : memref<4x256x32xbf16, #tpu.memory_space<vmem>>, vector<4x256x32xbf16>
    %c0_6 = arith.constant 0 : index
    %c0_7 = arith.constant 0 : index
    %2 = vector.load %arg3[%c0_6, %c0_7] : memref<128x32xbf16, #tpu.memory_space<vmem>>, vector<128x32xbf16>
    %cst = arith.constant 0.000000e+00 : f32
    %3 = vector.broadcast %cst : f32 to vector<128x32xf32>
    %4 = vector.extract_strided_slice %0 {offsets = [0, 0, 0, 0], sizes = [2, 8, 8, 128], strides = [1, 1, 1, 1]} : vector<2x10x10x128xbf16> to vector<2x8x8x128xbf16>
    %5 = vector.shape_cast %4 : vector<2x8x8x128xbf16> to vector<128x128xbf16>
    %6 = vector.extract_strided_slice %0 {offsets = [0, 0, 1, 0], sizes = [2, 8, 8, 128], strides = [1, 1, 1, 1]} : vector<2x10x10x128xbf16> to vector<2x8x8x128xbf16>
    %7 = vector.shape_cast %6 : vector<2x8x8x128xbf16> to vector<128x128xbf16>
    %8 = tpu.concatenate %5, %7 in 1 : vector<128x128xbf16>, vector<128x128xbf16> -> vector<128x256xbf16>
    %9 = vector.extract_strided_slice %1 {offsets = [0, 0, 0], sizes = [1, 256, 32], strides = [1, 1, 1]} : vector<4x256x32xbf16> to vector<1x256x32xbf16>
    %10 = vector.shape_cast %9 : vector<1x256x32xbf16> to vector<256x32xbf16>
    %cst_8 = arith.constant dense<0.000000e+00> : vector<128x32xf32>
    %11 = tpu.matmul %8, %10, %cst_8 {dimension_numbers = #tpu.dot_dimension_numbers<[1], [0], [0], [1], [0, 0, 1, 1], [], []>} : vector<128x256xbf16>, vector<256x32xbf16>, vector<128x32xf32> -> vector<128x32xf32>
    %12 = arith.addf %3, %11 : vector<128x32xf32>
    %13 = vector.extract_strided_slice %0 {offsets = [0, 0, 2, 0], sizes = [2, 8, 8, 128], strides = [1, 1, 1, 1]} : vector<2x10x10x128xbf16> to vector<2x8x8x128xbf16>
    %14 = vector.shape_cast %13 : vector<2x8x8x128xbf16> to vector<128x128xbf16>
    %15 = vector.extract_strided_slice %0 {offsets = [0, 1, 0, 0], sizes = [2, 8, 8, 128], strides = [1, 1, 1, 1]} : vector<2x10x10x128xbf16> to vector<2x8x8x128xbf16>
    %16 = vector.shape_cast %15 : vector<2x8x8x128xbf16> to vector<128x128xbf16>
    %17 = tpu.concatenate %14, %16 in 1 : vector<128x128xbf16>, vector<128x128xbf16> -> vector<128x256xbf16>
    %18 = vector.extract_strided_slice %1 {offsets = [1, 0, 0], sizes = [1, 256, 32], strides = [1, 1, 1]} : vector<4x256x32xbf16> to vector<1x256x32xbf16>
    %19 = vector.shape_cast %18 : vector<1x256x32xbf16> to vector<256x32xbf16>
    %cst_9 = arith.constant dense<0.000000e+00> : vector<128x32xf32>
    %20 = tpu.matmul %17, %19, %cst_9 {dimension_numbers = #tpu.dot_dimension_numbers<[1], [0], [0], [1], [0, 0, 1, 1], [], []>} : vector<128x256xbf16>, vector<256x32xbf16>, vector<128x32xf32> -> vector<128x32xf32>
    %21 = arith.addf %12, %20 : vector<128x32xf32>
    %22 = vector.extract_strided_slice %0 {offsets = [0, 1, 1, 0], sizes = [2, 8, 8, 128], strides = [1, 1, 1, 1]} : vector<2x10x10x128xbf16> to vector<2x8x8x128xbf16>
    %23 = vector.shape_cast %22 : vector<2x8x8x128xbf16> to vector<128x128xbf16>
    %24 = vector.extract_strided_slice %0 {offsets = [0, 1, 2, 0], sizes = [2, 8, 8, 128], strides = [1, 1, 1, 1]} : vector<2x10x10x128xbf16> to vector<2x8x8x128xbf16>
    %25 = vector.shape_cast %24 : vector<2x8x8x128xbf16> to vector<128x128xbf16>
    %26 = tpu.concatenate %23, %25 in 1 : vector<128x128xbf16>, vector<128x128xbf16> -> vector<128x256xbf16>
    %27 = vector.extract_strided_slice %1 {offsets = [2, 0, 0], sizes = [1, 256, 32], strides = [1, 1, 1]} : vector<4x256x32xbf16> to vector<1x256x32xbf16>
    %28 = vector.shape_cast %27 : vector<1x256x32xbf16> to vector<256x32xbf16>
    %cst_10 = arith.constant dense<0.000000e+00> : vector<128x32xf32>
    %29 = tpu.matmul %26, %28, %cst_10 {dimension_numbers = #tpu.dot_dimension_numbers<[1], [0], [0], [1], [0, 0, 1, 1], [], []>} : vector<128x256xbf16>, vector<256x32xbf16>, vector<128x32xf32> -> vector<128x32xf32>
    %30 = arith.addf %21, %29 : vector<128x32xf32>
    %31 = vector.extract_strided_slice %0 {offsets = [0, 2, 0, 0], sizes = [2, 8, 8, 128], strides = [1, 1, 1, 1]} : vector<2x10x10x128xbf16> to vector<2x8x8x128xbf16>
    %32 = vector.shape_cast %31 : vector<2x8x8x128xbf16> to vector<128x128xbf16>
    %33 = vector.extract_strided_slice %0 {offsets = [0, 2, 1, 0], sizes = [2, 8, 8, 128], strides = [1, 1, 1, 1]} : vector<2x10x10x128xbf16> to vector<2x8x8x128xbf16>
    %34 = vector.shape_cast %33 : vector<2x8x8x128xbf16> to vector<128x128xbf16>
    %35 = tpu.concatenate %32, %34 in 1 : vector<128x128xbf16>, vector<128x128xbf16> -> vector<128x256xbf16>
    %36 = vector.extract_strided_slice %1 {offsets = [3, 0, 0], sizes = [1, 256, 32], strides = [1, 1, 1]} : vector<4x256x32xbf16> to vector<1x256x32xbf16>
    %37 = vector.shape_cast %36 : vector<1x256x32xbf16> to vector<256x32xbf16>
    %cst_11 = arith.constant dense<0.000000e+00> : vector<128x32xf32>
    %38 = tpu.matmul %35, %37, %cst_11 {dimension_numbers = #tpu.dot_dimension_numbers<[1], [0], [0], [1], [0, 0, 1, 1], [], []>} : vector<128x256xbf16>, vector<256x32xbf16>, vector<128x32xf32> -> vector<128x32xf32>
    %39 = arith.addf %30, %38 : vector<128x32xf32>
    %40 = vector.extract_strided_slice %0 {offsets = [0, 2, 2, 0], sizes = [2, 8, 8, 128], strides = [1, 1, 1, 1]} : vector<2x10x10x128xbf16> to vector<2x8x8x128xbf16>
    %41 = vector.shape_cast %40 : vector<2x8x8x128xbf16> to vector<128x128xbf16>
    %cst_12 = arith.constant dense<0.000000e+00> : vector<128x32xf32>
    %42 = tpu.matmul %41, %2, %cst_12 {dimension_numbers = #tpu.dot_dimension_numbers<[1], [0], [0], [1], [0, 0, 1, 1], [], []>} : vector<128x128xbf16>, vector<128x32xbf16>, vector<128x32xf32> -> vector<128x32xf32>
    %43 = arith.addf %39, %42 : vector<128x32xf32>
    %c0_13 = arith.constant 0 : index
    %c0_14 = arith.constant 0 : index
    %44 = vector.load %arg4[%c0_13, %c0_14] : memref<1x32xf32, #tpu.memory_space<vmem>>, vector<1x32xf32>
    %45 = vector.broadcast %44 : vector<1x32xf32> to vector<128x32xf32>
    %46 = arith.addf %43, %45 : vector<128x32xf32>
    %cst_15 = arith.constant dense<0.000000e+00> : vector<32xf32>
    %47 = vector.multi_reduction <add>, %46, %cst_15 [0] : vector<128x32xf32> to vector<32xf32>
    %48 = vector.shape_cast %47 : vector<32xf32> to vector<1x32xf32>
    %49 = arith.mulf %46, %46 : vector<128x32xf32>
    %cst_16 = arith.constant dense<0.000000e+00> : vector<32xf32>
    %50 = vector.multi_reduction <add>, %49, %cst_16 [0] : vector<128x32xf32> to vector<32xf32>
    %51 = vector.shape_cast %50 : vector<32xf32> to vector<1x32xf32>
    %c0_i32 = arith.constant 0 : i32
    %52 = arith.cmpi eq, %arg0, %c0_i32 : i32
    %53 = arith.extui %52 : i1 to i32
    %c0_i32_17 = arith.constant 0 : i32
    %54 = arith.cmpi ne, %53, %c0_i32_17 : i32
    scf.if %54 {
      %cst_29 = arith.constant 0.000000e+00 : f32
      %94 = vector.broadcast %cst_29 : f32 to vector<1x32xf32>
      %c0_30 = arith.constant 0 : index
      %c0_31 = arith.constant 0 : index
      %95 = vector.load %arg13[%c0_30, %c0_31] : memref<1x32xf32, #tpu.memory_space<vmem>>, vector<1x32xf32>
      tpu.vector_store %arg13[%c0_30, %c0_31], %94 {strides = array<i32>} : memref<1x32xf32, #tpu.memory_space<vmem>>, vector<1x32xf32>,
      %cst_32 = arith.constant 0.000000e+00 : f32
      %96 = vector.broadcast %cst_32 : f32 to vector<1x32xf32>
      %c0_33 = arith.constant 0 : index
      %c0_34 = arith.constant 0 : index
      %97 = vector.load %arg14[%c0_33, %c0_34] : memref<1x32xf32, #tpu.memory_space<vmem>>, vector<1x32xf32>
      tpu.vector_store %arg14[%c0_33, %c0_34], %96 {strides = array<i32>} : memref<1x32xf32, #tpu.memory_space<vmem>>, vector<1x32xf32>,
    } else {
    }
    %c0_18 = arith.constant 0 : index
    %c0_19 = arith.constant 0 : index
    %55 = vector.load %arg13[%c0_18, %c0_19] : memref<1x32xf32, #tpu.memory_space<vmem>>, vector<1x32xf32>
    %56 = arith.addf %55, %48 : vector<1x32xf32>
    %c0_20 = arith.constant 0 : index
    %c0_21 = arith.constant 0 : index
    %57 = vector.load %arg13[%c0_20, %c0_21] : memref<1x32xf32, #tpu.memory_space<vmem>>, vector<1x32xf32>
    tpu.vector_store %arg13[%c0_20, %c0_21], %56 {strides = array<i32>} : memref<1x32xf32, #tpu.memory_space<vmem>>, vector<1x32xf32>,
    %c0_22 = arith.constant 0 : index
    %c0_23 = arith.constant 0 : index
    %58 = vector.load %arg14[%c0_22, %c0_23] : memref<1x32xf32, #tpu.memory_space<vmem>>, vector<1x32xf32>
    %59 = arith.addf %58, %51 : vector<1x32xf32>
    %c0_24 = arith.constant 0 : index
    %c0_25 = arith.constant 0 : index
    %60 = vector.load %arg14[%c0_24, %c0_25] : memref<1x32xf32, #tpu.memory_space<vmem>>, vector<1x32xf32>
    tpu.vector_store %arg14[%c0_24, %c0_25], %59 {strides = array<i32>} : memref<1x32xf32, #tpu.memory_space<vmem>>, vector<1x32xf32>,
    %61 = vector.shape_cast %46 : vector<128x32xf32> to vector<2x8x8x32xf32>
    %62 = vector.extract_strided_slice %61 {offsets = [0, 0, 0, 0], sizes = [2, 8, 1, 32], strides = [1, 1, 1, 1]} : vector<2x8x8x32xf32> to vector<2x8x1x32xf32>
    %63 = vector.shape_cast %62 : vector<2x8x1x32xf32> to vector<2x8x32xf32>
    %64 = vector.shape_cast %63 : vector<2x8x32xf32> to vector<16x32xf32>
    %65 = vector.extract_strided_slice %61 {offsets = [0, 0, 1, 0], sizes = [2, 8, 1, 32], strides = [1, 1, 1, 1]} : vector<2x8x8x32xf32> to vector<2x8x1x32xf32>
    %66 = vector.shape_cast %65 : vector<2x8x1x32xf32> to vector<2x8x32xf32>
    %67 = vector.shape_cast %66 : vector<2x8x32xf32> to vector<16x32xf32>
    %68 = vector.extract_strided_slice %61 {offsets = [0, 0, 2, 0], sizes = [2, 8, 1, 32], strides = [1, 1, 1, 1]} : vector<2x8x8x32xf32> to vector<2x8x1x32xf32>
    %69 = vector.shape_cast %68 : vector<2x8x1x32xf32> to vector<2x8x32xf32>
    %70 = vector.shape_cast %69 : vector<2x8x32xf32> to vector<16x32xf32>
    %71 = vector.extract_strided_slice %61 {offsets = [0, 0, 3, 0], sizes = [2, 8, 1, 32], strides = [1, 1, 1, 1]} : vector<2x8x8x32xf32> to vector<2x8x1x32xf32>
    %72 = vector.shape_cast %71 : vector<2x8x1x32xf32> to vector<2x8x32xf32>
    %73 = vector.shape_cast %72 : vector<2x8x32xf32> to vector<16x32xf32>
    %74 = vector.extract_strided_slice %61 {offsets = [0, 0, 4, 0], sizes = [2, 8, 1, 32], strides = [1, 1, 1, 1]} : vector<2x8x8x32xf32> to vector<2x8x1x32xf32>
    %75 = vector.shape_cast %74 : vector<2x8x1x32xf32> to vector<2x8x32xf32>
    %76 = vector.shape_cast %75 : vector<2x8x32xf32> to vector<16x32xf32>
    %77 = vector.extract_strided_slice %61 {offsets = [0, 0, 5, 0], sizes = [2, 8, 1, 32], strides = [1, 1, 1, 1]} : vector<2x8x8x32xf32> to vector<2x8x1x32xf32>
    %78 = vector.shape_cast %77 : vector<2x8x1x32xf32> to vector<2x8x32xf32>
    %79 = vector.shape_cast %78 : vector<2x8x32xf32> to vector<16x32xf32>
    %80 = vector.extract_strided_slice %61 {offsets = [0, 0, 6, 0], sizes = [2, 8, 1, 32], strides = [1, 1, 1, 1]} : vector<2x8x8x32xf32> to vector<2x8x1x32xf32>
    %81 = vector.shape_cast %80 : vector<2x8x1x32xf32> to vector<2x8x32xf32>
    %82 = vector.shape_cast %81 : vector<2x8x32xf32> to vector<16x32xf32>
    %83 = vector.extract_strided_slice %61 {offsets = [0, 0, 7, 0], sizes = [2, 8, 1, 32], strides = [1, 1, 1, 1]} : vector<2x8x8x32xf32> to vector<2x8x1x32xf32>
    %84 = vector.shape_cast %83 : vector<2x8x1x32xf32> to vector<2x8x32xf32>
    %85 = vector.shape_cast %84 : vector<2x8x32xf32> to vector<16x32xf32>
    %86 = tpu.concatenate %64, %67, %70, %73, %76, %79, %82, %85 in 1 : vector<16x32xf32>, vector<16x32xf32>, vector<16x32xf32>, vector<16x32xf32>, vector<16x32xf32>, vector<16x32xf32>, vector<16x32xf32>, vector<16x32xf32> -> vector<16x256xf32>
    %c16_i32 = arith.constant 16 : i32
    %87 = arith.muli %arg0, %c16_i32 : i32
    %88 = tpu.assume_multiple %87, 8 : i32
    %89 = arith.index_cast %88 : i32 to index
    %c0_26 = arith.constant 0 : index
    %90 = vector.load %arg12[%89, %c0_26] : memref<16x256xf32, #tpu.memory_space<vmem>>, vector<16x256xf32>
    tpu.vector_store %arg12[%89, %c0_26], %86 {strides = array<i32>} : memref<16x256xf32, #tpu.memory_space<vmem>>, vector<16x256xf32>,
    %c0_i32_27 = arith.constant 0 : i32
    %91 = arith.cmpi eq, %arg0, %c0_i32_27 : i32
    %92 = arith.extui %91 : i1 to i32
    %c0_i32_28 = arith.constant 0 : i32
    %93 = arith.cmpi ne, %92, %c0_i32_28 : i32
    scf.if %93 {
      %c0_29 = arith.constant 0 : index
      %c0_30 = arith.constant 0 : index
      %94 = vector.load %arg13[%c0_29, %c0_30] : memref<1x32xf32, #tpu.memory_space<vmem>>, vector<1x32xf32>
      %cst_31 = arith.constant 1.280000e+02 : f32
      %95 = vector.broadcast %cst_31 : f32 to vector<1x32xf32>
      %96 = arith.divf %94, %95 : vector<1x32xf32>
      %c0_32 = arith.constant 0 : index
      %c0_33 = arith.constant 0 : index
      %97 = vector.load %arg14[%c0_32, %c0_33] : memref<1x32xf32, #tpu.memory_space<vmem>>, vector<1x32xf32>
      %cst_34 = arith.constant 1.280000e+02 : f32
      %98 = vector.broadcast %cst_34 : f32 to vector<1x32xf32>
      %99 = arith.divf %97, %98 : vector<1x32xf32>
      %100 = arith.mulf %96, %96 : vector<1x32xf32>
      %101 = arith.subf %99, %100 : vector<1x32xf32>
      %cst_35 = arith.constant 0.000000e+00 : f32
      %102 = vector.broadcast %cst_35 : f32 to vector<1x32xf32>
      %103 = arith.maximumf %101, %102 : vector<1x32xf32>
      %c0_36 = arith.constant 0 : index
      %c0_37 = arith.constant 0 : index
      %104 = vector.load %arg5[%c0_36, %c0_37] : memref<1x32xf32, #tpu.memory_space<vmem>>, vector<1x32xf32>
      %cst_38 = arith.constant 9.99999974E-6 : f32
      %105 = vector.broadcast %cst_38 : f32 to vector<1x32xf32>
      %106 = arith.addf %103, %105 : vector<1x32xf32>
      %107 = math.rsqrt %106 : vector<1x32xf32>
      %108 = arith.mulf %104, %107 : vector<1x32xf32>
      %c0_39 = arith.constant 0 : index
      %c0_40 = arith.constant 0 : index
      %109 = vector.load %arg6[%c0_39, %c0_40] : memref<1x32xf32, #tpu.memory_space<vmem>>, vector<1x32xf32>
      %110 = arith.mulf %96, %108 : vector<1x32xf32>
      %111 = arith.subf %109, %110 : vector<1x32xf32>
      %112 = tpu.concatenate %108, %108, %108, %108, %108, %108, %108, %108 in 1 : vector<1x32xf32>, vector<1x32xf32>, vector<1x32xf32>, vector<1x32xf32>, vector<1x32xf32>, vector<1x32xf32>, vector<1x32xf32>, vector<1x32xf32> -> vector<1x256xf32>
      %113 = tpu.concatenate %111, %111, %111, %111, %111, %111, %111, %111 in 1 : vector<1x32xf32>, vector<1x32xf32>, vector<1x32xf32>, vector<1x32xf32>, vector<1x32xf32>, vector<1x32xf32>, vector<1x32xf32>, vector<1x32xf32> -> vector<1x256xf32>
      %c0_41 = arith.constant 0 : index
      %c0_42 = arith.constant 0 : index
      %114 = vector.load %arg7[%c0_41, %c0_42] : memref<512x64xbf16, #tpu.memory_space<vmem>>, vector<512x64xbf16>
      %c0_43 = arith.constant 0 : index
      %c0_44 = arith.constant 0 : index
      %115 = vector.load %arg8[%c0_43, %c0_44] : memref<1x64xf32, #tpu.memory_space<vmem>>, vector<1x64xf32>
      %c0_45 = arith.constant 0 : index
      %c0_46 = arith.constant 0 : index
      %116 = vector.load %arg9[%c0_45, %c0_46] : memref<1x64xf32, #tpu.memory_space<vmem>>, vector<1x64xf32>
      %c0_47 = arith.constant 0 : index
      %c0_48 = arith.constant 0 : index
      %117 = vector.load %arg10[%c0_47, %c0_48] : memref<1x1xf32, #tpu.memory_space<vmem>>, vector<1x1xf32>
      %c0_49 = arith.constant 0 : index
      %c0_50 = arith.constant 0 : index
      %118 = vector.load %arg12[%c0_49, %c0_50] : memref<16x256xf32, #tpu.memory_space<vmem>>, vector<16x256xf32>
      %119 = vector.broadcast %112 : vector<1x256xf32> to vector<16x256xf32>
      %120 = arith.mulf %118, %119 : vector<16x256xf32>
      %121 = vector.broadcast %113 : vector<1x256xf32> to vector<16x256xf32>
      %122 = arith.addf %120, %121 : vector<16x256xf32>
      %cst_51 = arith.constant 0.000000e+00 : f32
      %123 = vector.broadcast %cst_51 : f32 to vector<16x256xf32>
      %124 = arith.maximumf %122, %123 : vector<16x256xf32>
      %125 = vector.shape_cast %124 : vector<16x256xf32> to vector<2x8x256xf32>
      %126 = vector.extract_strided_slice %125 {offsets = [0, 0, 0], sizes = [2, 1, 256], strides = [1, 1, 1]} : vector<2x8x256xf32> to vector<2x1x256xf32>
      %127 = vector.shape_cast %126 : vector<2x1x256xf32> to vector<2x256xf32>
      %128 = vector.extract_strided_slice %125 {offsets = [0, 1, 0], sizes = [2, 1, 256], strides = [1, 1, 1]} : vector<2x8x256xf32> to vector<2x1x256xf32>
      %129 = vector.shape_cast %128 : vector<2x1x256xf32> to vector<2x256xf32>
      %130 = arith.maximumf %127, %129 : vector<2x256xf32>
      %131 = vector.extract_strided_slice %130 {offsets = [0, 0], sizes = [2, 32], strides = [1, 1]} : vector<2x256xf32> to vector<2x32xf32>
      %132 = vector.extract_strided_slice %130 {offsets = [0, 32], sizes = [2, 32], strides = [1, 1]} : vector<2x256xf32> to vector<2x32xf32>
      %133 = arith.maximumf %131, %132 : vector<2x32xf32>
      %134 = vector.extract_strided_slice %130 {offsets = [0, 64], sizes = [2, 32], strides = [1, 1]} : vector<2x256xf32> to vector<2x32xf32>
      %135 = vector.extract_strided_slice %130 {offsets = [0, 96], sizes = [2, 32], strides = [1, 1]} : vector<2x256xf32> to vector<2x32xf32>
      %136 = arith.maximumf %134, %135 : vector<2x32xf32>
      %137 = vector.extract_strided_slice %130 {offsets = [0, 128], sizes = [2, 32], strides = [1, 1]} : vector<2x256xf32> to vector<2x32xf32>
      %138 = vector.extract_strided_slice %130 {offsets = [0, 160], sizes = [2, 32], strides = [1, 1]} : vector<2x256xf32> to vector<2x32xf32>
      %139 = arith.maximumf %137, %138 : vector<2x32xf32>
      %140 = vector.extract_strided_slice %130 {offsets = [0, 192], sizes = [2, 32], strides = [1, 1]} : vector<2x256xf32> to vector<2x32xf32>
      %141 = vector.extract_strided_slice %130 {offsets = [0, 224], sizes = [2, 32], strides = [1, 1]} : vector<2x256xf32> to vector<2x32xf32>
      %142 = arith.maximumf %140, %141 : vector<2x32xf32>
      %143 = vector.extract_strided_slice %125 {offsets = [0, 2, 0], sizes = [2, 1, 256], strides = [1, 1, 1]} : vector<2x8x256xf32> to vector<2x1x256xf32>
      %144 = vector.shape_cast %143 : vector<2x1x256xf32> to vector<2x256xf32>
      %145 = vector.extract_strided_slice %125 {offsets = [0, 3, 0], sizes = [2, 1, 256], strides = [1, 1, 1]} : vector<2x8x256xf32> to vector<2x1x256xf32>
      %146 = vector.shape_cast %145 : vector<2x1x256xf32> to vector<2x256xf32>
      %147 = arith.maximumf %144, %146 : vector<2x256xf32>
      %148 = vector.extract_strided_slice %147 {offsets = [0, 0], sizes = [2, 32], strides = [1, 1]} : vector<2x256xf32> to vector<2x32xf32>
      %149 = vector.extract_strided_slice %147 {offsets = [0, 32], sizes = [2, 32], strides = [1, 1]} : vector<2x256xf32> to vector<2x32xf32>
      %150 = arith.maximumf %148, %149 : vector<2x32xf32>
      %151 = vector.extract_strided_slice %147 {offsets = [0, 64], sizes = [2, 32], strides = [1, 1]} : vector<2x256xf32> to vector<2x32xf32>
      %152 = vector.extract_strided_slice %147 {offsets = [0, 96], sizes = [2, 32], strides = [1, 1]} : vector<2x256xf32> to vector<2x32xf32>
      %153 = arith.maximumf %151, %152 : vector<2x32xf32>
      %154 = vector.extract_strided_slice %147 {offsets = [0, 128], sizes = [2, 32], strides = [1, 1]} : vector<2x256xf32> to vector<2x32xf32>
      %155 = vector.extract_strided_slice %147 {offsets = [0, 160], sizes = [2, 32], strides = [1, 1]} : vector<2x256xf32> to vector<2x32xf32>
      %156 = arith.maximumf %154, %155 : vector<2x32xf32>
      %157 = vector.extract_strided_slice %147 {offsets = [0, 192], sizes = [2, 32], strides = [1, 1]} : vector<2x256xf32> to vector<2x32xf32>
      %158 = vector.extract_strided_slice %147 {offsets = [0, 224], sizes = [2, 32], strides = [1, 1]} : vector<2x256xf32> to vector<2x32xf32>
      %159 = arith.maximumf %157, %158 : vector<2x32xf32>
      %160 = vector.extract_strided_slice %125 {offsets = [0, 4, 0], sizes = [2, 1, 256], strides = [1, 1, 1]} : vector<2x8x256xf32> to vector<2x1x256xf32>
      %161 = vector.shape_cast %160 : vector<2x1x256xf32> to vector<2x256xf32>
      %162 = vector.extract_strided_slice %125 {offsets = [0, 5, 0], sizes = [2, 1, 256], strides = [1, 1, 1]} : vector<2x8x256xf32> to vector<2x1x256xf32>
      %163 = vector.shape_cast %162 : vector<2x1x256xf32> to vector<2x256xf32>
      %164 = arith.maximumf %161, %163 : vector<2x256xf32>
      %165 = vector.extract_strided_slice %164 {offsets = [0, 0], sizes = [2, 32], strides = [1, 1]} : vector<2x256xf32> to vector<2x32xf32>
      %166 = vector.extract_strided_slice %164 {offsets = [0, 32], sizes = [2, 32], strides = [1, 1]} : vector<2x256xf32> to vector<2x32xf32>
      %167 = arith.maximumf %165, %166 : vector<2x32xf32>
      %168 = vector.extract_strided_slice %164 {offsets = [0, 64], sizes = [2, 32], strides = [1, 1]} : vector<2x256xf32> to vector<2x32xf32>
      %169 = vector.extract_strided_slice %164 {offsets = [0, 96], sizes = [2, 32], strides = [1, 1]} : vector<2x256xf32> to vector<2x32xf32>
      %170 = arith.maximumf %168, %169 : vector<2x32xf32>
      %171 = vector.extract_strided_slice %164 {offsets = [0, 128], sizes = [2, 32], strides = [1, 1]} : vector<2x256xf32> to vector<2x32xf32>
      %172 = vector.extract_strided_slice %164 {offsets = [0, 160], sizes = [2, 32], strides = [1, 1]} : vector<2x256xf32> to vector<2x32xf32>
      %173 = arith.maximumf %171, %172 : vector<2x32xf32>
      %174 = vector.extract_strided_slice %164 {offsets = [0, 192], sizes = [2, 32], strides = [1, 1]} : vector<2x256xf32> to vector<2x32xf32>
      %175 = vector.extract_strided_slice %164 {offsets = [0, 224], sizes = [2, 32], strides = [1, 1]} : vector<2x256xf32> to vector<2x32xf32>
      %176 = arith.maximumf %174, %175 : vector<2x32xf32>
      %177 = vector.extract_strided_slice %125 {offsets = [0, 6, 0], sizes = [2, 1, 256], strides = [1, 1, 1]} : vector<2x8x256xf32> to vector<2x1x256xf32>
      %178 = vector.shape_cast %177 : vector<2x1x256xf32> to vector<2x256xf32>
      %179 = vector.extract_strided_slice %125 {offsets = [0, 7, 0], sizes = [2, 1, 256], strides = [1, 1, 1]} : vector<2x8x256xf32> to vector<2x1x256xf32>
      %180 = vector.shape_cast %179 : vector<2x1x256xf32> to vector<2x256xf32>
      %181 = arith.maximumf %178, %180 : vector<2x256xf32>
      %182 = vector.extract_strided_slice %181 {offsets = [0, 0], sizes = [2, 32], strides = [1, 1]} : vector<2x256xf32> to vector<2x32xf32>
      %183 = vector.extract_strided_slice %181 {offsets = [0, 32], sizes = [2, 32], strides = [1, 1]} : vector<2x256xf32> to vector<2x32xf32>
      %184 = arith.maximumf %182, %183 : vector<2x32xf32>
      %185 = vector.extract_strided_slice %181 {offsets = [0, 64], sizes = [2, 32], strides = [1, 1]} : vector<2x256xf32> to vector<2x32xf32>
      %186 = vector.extract_strided_slice %181 {offsets = [0, 96], sizes = [2, 32], strides = [1, 1]} : vector<2x256xf32> to vector<2x32xf32>
      %187 = arith.maximumf %185, %186 : vector<2x32xf32>
      %188 = vector.extract_strided_slice %181 {offsets = [0, 128], sizes = [2, 32], strides = [1, 1]} : vector<2x256xf32> to vector<2x32xf32>
      %189 = vector.extract_strided_slice %181 {offsets = [0, 160], sizes = [2, 32], strides = [1, 1]} : vector<2x256xf32> to vector<2x32xf32>
      %190 = arith.maximumf %188, %189 : vector<2x32xf32>
      %191 = vector.extract_strided_slice %181 {offsets = [0, 192], sizes = [2, 32], strides = [1, 1]} : vector<2x256xf32> to vector<2x32xf32>
      %192 = vector.extract_strided_slice %181 {offsets = [0, 224], sizes = [2, 32], strides = [1, 1]} : vector<2x256xf32> to vector<2x32xf32>
      %193 = arith.maximumf %191, %192 : vector<2x32xf32>
      %194 = tpu.concatenate %133, %136, %139, %142, %150, %153, %156, %159, %167, %170, %173, %176, %184, %187, %190, %193 in 1 : vector<2x32xf32>, vector<2x32xf32>, vector<2x32xf32>, vector<2x32xf32>, vector<2x32xf32>, vector<2x32xf32>, vector<2x32xf32>, vector<2x32xf32>, vector<2x32xf32>, vector<2x32xf32>, vector<2x32xf32>, vector<2x32xf32>, vector<2x32xf32>, vector<2x32xf32>, vector<2x32xf32>, vector<2x32xf32> -> vector<2x512xf32>
      %195 = arith.truncf %194 : vector<2x512xf32> to vector<2x512xbf16>
      %cst_52 = arith.constant dense<0.000000e+00> : vector<2x64xf32>
      %196 = tpu.matmul %195, %114, %cst_52 {dimension_numbers = #tpu.dot_dimension_numbers<[1], [0], [0], [1], [0, 0, 1, 1], [], []>} : vector<2x512xbf16>, vector<512x64xbf16>, vector<2x64xf32> -> vector<2x64xf32>
      %197 = vector.broadcast %115 : vector<1x64xf32> to vector<2x64xf32>
      %198 = arith.addf %196, %197 : vector<2x64xf32>
      %cst_53 = arith.constant 0.000000e+00 : f32
      %199 = vector.broadcast %cst_53 : f32 to vector<2x64xf32>
      %200 = arith.maximumf %198, %199 : vector<2x64xf32>
      %201 = vector.broadcast %116 : vector<1x64xf32> to vector<2x64xf32>
      %202 = arith.mulf %200, %201 : vector<2x64xf32>
      %cst_54 = arith.constant dense<0.000000e+00> : vector<2xf32>
      %203 = vector.multi_reduction <add>, %202, %cst_54 [1] : vector<2x64xf32> to vector<2xf32>
      %204 = vector.shape_cast %203 : vector<2xf32> to vector<2x1xf32>
      %205 = vector.broadcast %117 : vector<1x1xf32> to vector<2x1xf32>
      %206 = arith.addf %204, %205 : vector<2x1xf32>
      %207 = vector.shape_cast %206 : vector<2x1xf32> to vector<2x1xf32>
      %208 = vector.broadcast %207 : vector<2x1xf32> to vector<2x64xf32>
      %209 = tpu.concatenate %200, %208 in 1 : vector<2x64xf32>, vector<2x64xf32> -> vector<2x128xf32>
      %c0_55 = arith.constant 0 : index
      %c0_56 = arith.constant 0 : index
      %210 = vector.load %arg11[%c0_55, %c0_56] : memref<2x128xf32, #tpu.memory_space<vmem>>, vector<2x128xf32>
      tpu.vector_store %arg11[%c0_55, %c0_56], %209 {strides = array<i32>} : memref<2x128xf32, #tpu.memory_space<vmem>>, vector<2x128xf32>,
    } else {
    }
    return
  }
  func.func @transform_0(%arg0: i32) -> (i32, i32, i32, i32) {
    %c0_i32 = arith.constant 0 : i32
    %c0_i32_0 = arith.constant 0 : i32
    %c0_i32_1 = arith.constant 0 : i32
    %c0_i32_2 = arith.constant 0 : i32
    return %arg0, %c0_i32, %c0_i32_0, %c0_i32_1 : i32, i32, i32, i32
  }
  func.func @transform_1(%arg0: i32) -> (i32, i32, i32) {
    %c0_i32 = arith.constant 0 : i32
    %c0_i32_0 = arith.constant 0 : i32
    %c0_i32_1 = arith.constant 0 : i32
    %c0_i32_2 = arith.constant 0 : i32
    return %c0_i32, %c0_i32_0, %c0_i32_1 : i32, i32, i32
  }
  func.func @transform_2(%arg0: i32) -> (i32, i32) {
    %c0_i32 = arith.constant 0 : i32
    %c0_i32_0 = arith.constant 0 : i32
    %c0_i32_1 = arith.constant 0 : i32
    return %c0_i32, %c0_i32_0 : i32, i32
  }
  func.func @transform_3(%arg0: i32) -> (i32, i32) {
    %c0_i32 = arith.constant 0 : i32
    %c0_i32_0 = arith.constant 0 : i32
    %c0_i32_1 = arith.constant 0 : i32
    return %c0_i32, %c0_i32_0 : i32, i32
  }
  func.func @transform_4(%arg0: i32) -> (i32, i32) {
    %c0_i32 = arith.constant 0 : i32
    %c0_i32_0 = arith.constant 0 : i32
    %c0_i32_1 = arith.constant 0 : i32
    return %c0_i32, %c0_i32_0 : i32, i32
  }
  func.func @transform_5(%arg0: i32) -> (i32, i32) {
    %c0_i32 = arith.constant 0 : i32
    %c0_i32_0 = arith.constant 0 : i32
    %c0_i32_1 = arith.constant 0 : i32
    return %c0_i32, %c0_i32_0 : i32, i32
  }
  func.func @transform_6(%arg0: i32) -> (i32, i32) {
    %c0_i32 = arith.constant 0 : i32
    %c0_i32_0 = arith.constant 0 : i32
    %c0_i32_1 = arith.constant 0 : i32
    return %c0_i32, %c0_i32_0 : i32, i32
  }
  func.func @transform_7(%arg0: i32) -> (i32, i32) {
    %c0_i32 = arith.constant 0 : i32
    %c0_i32_0 = arith.constant 0 : i32
    %c0_i32_1 = arith.constant 0 : i32
    return %c0_i32, %c0_i32_0 : i32, i32
  }
  func.func @transform_8(%arg0: i32) -> (i32, i32) {
    %c0_i32 = arith.constant 0 : i32
    %c0_i32_0 = arith.constant 0 : i32
    %c0_i32_1 = arith.constant 0 : i32
    return %c0_i32, %c0_i32_0 : i32, i32
  }
  func.func @transform_9(%arg0: i32) -> (i32, i32) {
    %c0_i32 = arith.constant 0 : i32
    %c0_i32_0 = arith.constant 0 : i32
    %c0_i32_1 = arith.constant 0 : i32
    return %c0_i32, %c0_i32_0 : i32, i32
  }
  func.func @transform_10(%arg0: i32) -> (i32, i32) {
    %c0_i32 = arith.constant 0 : i32
    %c0_i32_0 = arith.constant 0 : i32
    %c0_i32_1 = arith.constant 0 : i32
    return %c0_i32, %c0_i32_0 : i32, i32
  }
}

</mosaic_0001>

<bundles_post_ra>
// kernel: dot_classification_forward.1
= control target key start
LH: loop header
LB: loop body
LE: loop exit
PB: predicated region body
PF: predicated region fallthrough
CT: control target
= control target key end

     0   :  { %vm222_vm0 = vsmask.f32 3328  ;;  %vm223_vm1 = vsmask.f32 7440  ;;  %vm545_vm2 = vcmask 1042432   ;;  %vm546_vm3 = vcmask 1046532   ;;  %s4990_s1 = inlined_call_operand.vmem [shape: bf16[4,256,32], index: 1, kind: input, shape index: {}]   ;;  %s4991_s0 = inlined_call_operand.vmem [shape: bf16[2,10,10,128], index: 0, kind: input, shape index: {}]   ;;  %s4992_s2 = inlined_call_operand.vmem [shape: bf16[128,32], index: 2, kind: input, shape index: {}]   ;;  %s4993_s3 = inlined_call_operand.vmem [shape: f32[1,32], index: 3, kind: input, shape index: {}]   ;;  %s4994_s4 = inlined_call_operand.vmem [shape: f32[1,32], index: 4, kind: input, shape index: {}]   ;;  %s4995_s5 = inlined_call_operand.vmem [shape: f32[1,32], index: 5, kind: input, shape index: {}]   ;;  %s4996_s6 = inlined_call_operand.vmem [shape: bf16[512,64], index: 6, kind: input, shape index: {}]   ;;  %s4997_s9 = inlined_call_operand.<no memory space> [shape: f32[1,1], index: 9, kind: input, shape index: {}]   ;;  %s4998_s7 = inlined_call_operand.vmem [shape: f32[1,64], index: 7, kind: input, shape index: {}]   ;;  %s4999_s8 = inlined_call_operand.vmem [shape: f32[1,64], index: 8, kind: input, shape index: {}]   ;;  %s5000_s10 = inlined_call_operand.vmem [shape: f32[2,128], index: 10, kind: output, shape index: {}]  }
   0x1   :  { %v3348_v0 = vld [vmem:[%s4990_s1 + $0xf8] sm:$0xff]   ;;  %v3352_v4 = vld [vmem:[%s4990_s1 + $0xf0] sm:$0xff]   ;;  %v3356_v8 = vld [vmem:[%s4990_s1 + $0xe8] sm:$0xff]   ;;  %vm1879_vm6 = vcmask 253952   ;;  %vm1784_vm7 = vcmask 261120   ;;  %vm1906_vm8 = vcmask 1041409  }
   0x2   :  { %v3349_v1 = vld [vmem:[%s4990_s1 + $0x78] sm:$0xff]   ;;  %2953 = vmatprep.subr.bf16.mxu0 %v3348_v0  ;;  %v3353_v5 = vld [vmem:[%s4990_s1 + $0x70] sm:$0xff]   ;;  %v3357_v9 = vld [vmem:[%s4990_s1 + $0x68] sm:$0xff]   ;;  %vm1909_vm9 = vcmask 1042434   ;;  %vm1912_vm10 = vcmask 1043459   ;;  %vm1915_vm11 = vcmask 1044484  }
   0x3   :  { %v3350_v2 = vld [vmem:[%s4990_s1 + $0xb8] sm:$0xff]   ;;  %3017 = vmatprep.subr.bf16.mxu1 %v3349_v1  ;;  %v3354_v6 = vld [vmem:[%s4990_s1 + $0xb0] sm:$0xff]   ;;  %v3358_v10 = vld [vmem:[%s4990_s1 + $0xa8] sm:$0xff]   ;;  %vm1918_vm12 = vcmask 1045509   ;;  %vm1921_vm13 = vcmask 1046534   ;;  %vm1924_vm14 = vcmask 1047559  }
   0x4   :  { %v3351_v3 = vld [vmem:[%s4990_s1 + $0x38] sm:$0xff]   ;;  %2954 = vmatpush3.bf16.msra.mxu0 %v3350_v2  ;;  %v3355_v7 = vld [vmem:[%s4990_s1 + $0x30] sm:$0xff]   ;;  %v3359_v11 = vld [vmem:[%s4990_s1 + $0x28] sm:$0xff]   ;;  %s3474_s15 = smov 64   ;;  %s3475_s16 = smov 96   ;;  %vm2178_vm15 = vcmask 523264  }
   0x5   :  { %3018 = vmatpush3.bf16.msra.mxu1 %v3351_v3  ;;  %2955 = vmatprep.subr.bf16.mxu0 %v3352_v4  ;;  %v3360_v12 = vld [vmem:[%s4990_s1 + $0xe0] sm:$0xff]   ;;  %v3364_v16 = vld [vmem:[%s4990_s1 + $0xd8] sm:$0xff]   ;;  %v3368_v20 = vld [vmem:[%s4990_s1 + $0xd0] sm:$0xff]  }
   0x6   :  { %3019 = vmatprep.subr.bf16.mxu1 %v3353_v5  ;;  %v3361_v13 = vld [vmem:[%s4990_s1 + $0x60] sm:$0xff]   ;;  %v3365_v17 = vld [vmem:[%s4990_s1 + $0x58] sm:$0xff]   ;;  %v3369_v21 = vld [vmem:[%s4990_s1 + $0x50] sm:$0xff]  }
   0x7   :  { %v3362_v14 = vld [vmem:[%s4990_s1 + $0xa0] sm:$0xff]   ;;  %v3366_v18 = vld [vmem:[%s4990_s1 + $0x98] sm:$0xff]   ;;  %v3370_v22 = vld [vmem:[%s4990_s1 + $0x90] sm:$0xff]  }
   0x8   :  { %2956 = vmatpush3.bf16.msra.mxu0 %v3354_v6  ;;  %v3363_v15 = vld [vmem:[%s4990_s1 + $0x20] sm:$0xff]   ;;  %v3367_v19 = vld [vmem:[%s4990_s1 + $0x18] sm:$0xff]   ;;  %v3371_v23 = vld [vmem:[%s4990_s1 + $0x10] sm:$0xff]  }
   0x9   :  { %3020 = vmatpush3.bf16.msra.mxu1 %v3355_v7  ;;  %2957 = vmatprep.subr.bf16.mxu0 %v3356_v8  ;;  %v3372_v24 = vld [vmem:[%s4990_s1 + $0xc8] sm:$0xff]   ;;  %v3376_v28 = vld [vmem:[%s4990_s1 + $0xc0] sm:$0xff]   ;;  %v3636_v33 = vld [vmem:[%s4991_s0 + $0x10] sm:$0xf] }
   0xa   :  { %3021 = vmatprep.subr.bf16.mxu1 %v3357_v9  ;;  %v3373_v25 = vld [vmem:[%s4990_s1 + $0x48] sm:$0xff]   ;;  %v3377_v29 = vld [vmem:[%s4990_s1 + $0x40] sm:$0xff]   ;;  %v3654_v38 = vld [vmem:[%s4991_s0 + $0x14] sm:$0x1]  ;;  %v254_v45 = vshrl.u32 %v3636_v33, 16  ;;  %v257_v46 = vshll.u32 %v3636_v33, 16 }
   0xb   :  { %v3374_v26 = vld [vmem:[%s4990_s1 + $0x88] sm:$0xff]   ;;  %v3378_v30 = vld [vmem:[%s4990_s1 + $0x80] sm:$0xff]   ;;  %v3382_v51 = vld [vmem:[%s4990_s1 + $0x178] sm:$0xff]   ;;  %v263_v57 = vshll.u32 %v3654_v38, 16 }
   0xc   :  { %2958 = vmatpush3.bf16.msra.mxu0 %v3358_v10  ;;  %v3375_v27 = vld [vmem:[%s4990_s1 + $0x8] sm:$0xff]   ;;  %v3379_v31 = vld [vmem:[%s4990_s1] sm:$0xff]   ;;  %v256_v54 = vrot.slane %v254_v45, 4  ;;  %v259_v55 = vrot.slane %v257_v46, 5  ;;  %vm3668_vm4 = vmor %vm545_vm2, %vm546_vm3 }
   0xd   :  { %3022 = vmatpush3.bf16.msra.mxu1 %v3359_v11  ;;  %2959 = vmatprep.subr.bf16.mxu0 %v3360_v12  ;;  %v3631_v32 = vld [vmem:[%s4991_s0 + $0x8] sm:$0xf]  ;;  %v3641_v34 = vld [vmem:[%s4991_s0] sm:$0xf]  ;;  %v39_v36 = vld [vmem:[%s4991_s0 + $0x4] sm:$0x1] }
   0xe   :  { %3023 = vmatprep.subr.bf16.mxu1 %v3361_v13  ;;  %v2811_v35 = vcombine.low %v3631_v32, %v3636_v33  ;;  %v41_v37 = vld [vmem:[%s4991_s0 + $0xc] sm:$0x1]  ;;  %v226_v39 = vshrl.u32 %v3641_v34, 16  ;;  %v229_v40 = vshll.u32 %v3641_v34, 16  ;;  %v235_v41 = vshll.u32 %v39_v36, 16  ;;  %vm3674_vm5 = vmor %vm222_vm0, %vm223_vm1  ;;  %v3383_v2 = vld [vmem:[%s4990_s1 + $0x138] sm:$0xff]  }
   0xf   :  { %v240_v42 = vshrl.u32 %v3631_v32, 16  ;;  %v243_v43 = vshll.u32 %v3631_v32, 16  ;;  %v249_v44 = vshll.u32 %v41_v37, 16  ;;  %v550_v58 = vrot.slane %v39_v36, 5  ;;  %v44_v3 = vld [vmem:[%s4991_s0 + $0x18] sm:$0xf] }
  0x10   :  { %2960 = vmatpush3.bf16.msra.mxu0 %v3362_v14  ;;  %792 = vmatprep.mubr.bf16.mxu0 %v2811_v35  ;;  %v228_v47 = vrot.slane %v226_v39, 4  ;;  %v231_v48 = vrot.slane %v229_v40, 5  ;;  %v237_v49 = vrot.slane %v235_v41, 5  ;;  %v554_v59 = vrot.slane %v41_v37, 5  ;;  %v3689_v4 = vld [vmem:[%s4991_s0 + $0x20] sm:$0xf] }
  0x11   :  { %3024 = vmatpush3.bf16.msra.mxu1 %v3363_v15  ;;  %2961 = vmatprep.subr.bf16.mxu0 %v3364_v16  ;;  %v242_v50 = vrot.slane %v240_v42, 4  ;;  %v245_v52 = vrot.slane %v243_v43, 5  ;;  %v251_v53 = vrot.slane %v249_v44, 5  ;;  %v260_v63 = vor.u32 %v259_v55, %v256_v54  ;;  %v45_v8 = vld [vmem:[%s4991_s0 + $0x1c] sm:$0x1]  ;;  %v3386_v10 = vld [vmem:[%s4990_s1 + $0x170] sm:$0xff]  }
  0x12   :  { %3025 = vmatprep.subr.bf16.mxu1 %v3365_v17  ;;  %v232_v56 = vor.u32 %v231_v48, %v228_v47  ;;  %v2787_v0 = vrot.slane %v3641_v34, 9  ;;  %v2788_v1 = vrot.slane %v3631_v32, 9  ;;  %v265_v6 = vrot.slane %v263_v57, 5  ;;  %v3387_v36 = vld [vmem:[%s4990_s1 + $0x130] sm:$0xff]   ;;  %v3769_v54 = vld [vmem:[%s4991_s0 + $0x38] sm:$0xf] }
  0x13   :  { %v246_v62 = vor.u32 %v245_v52, %v242_v50  ;;  %v2812_v7 = vcombine.low %v44_v3, %v3689_v4  ;;  %v268_v9 = vshrl.u32 %v44_v3, 16  ;;  %v261_v12 = vrot.slane %v260_v63, 4 }
  0x14   :  { %2962 = vmatpush3.bf16.msra.mxu0 %v3366_v18  ;;  %v233_v5 = vrot.slane %v232_v56, 4  ;;  %v551_v13 = vsel %vm3668_vm4, %v2787_v0, %v550_v58  ;;  %v3702_v14 = vsel %vm3668_vm4, %v2788_v1, %v554_v59  ;;  %v271_v18 = vshll.u32 %v44_v3, 16  ;;  %v3779_v59 = vld [vmem:[%s4991_s0 + $0x40] sm:$0xf] }
  0x15   :  { %3026 = vmatpush3.bf16.msra.mxu1 %v3367_v19  ;;  %2963 = vmatprep.subr.bf16.mxu0 %v3368_v20  ;;  %v247_v11 = vrot.slane %v246_v62, 4  ;;  %v2803_v16 = vcombine.low %v551_v13, %v3702_v14  ;;  %v270_v17 = vrot.slane %v268_v9, 4  ;;  %v2771_v20 = vcombine.low %v3641_v34, %v3631_v32  ;;  %v3394_v62 = vld [vmem:[%s4990_s1 + $0x160] sm:$0xff]  }
  0x16   :  { %3027 = vmatprep.subr.bf16.mxu1 %v3369_v21  ;;  %v238_v15 = vsel %vm3674_vm5, %v233_v5, %v237_v49  ;;  %v277_v21 = vshll.u32 %v45_v8, 16  ;;  %v2790_v32 = vrot.slane %v44_v3, 9  ;;  %v562_v34 = vrot.slane %v45_v8, 5  ;;  %v3391_v49 = vld [vmem:[%s4990_s1 + $0x128] sm:$0xff]   ;;  %v3399_v8 = vld [vmem:[%s4990_s1 + $0x1f8] sm:$0xff]   ;;  %v3395_v13 = vld [vmem:[%s4990_s1 + $0x120] sm:$0xff]  }
  0x17   :  { %v3709_v19 = vsel %vm3674_vm5, %v247_v11, %v251_v53  ;;  %v3737_v35 = vcombine.low %v3636_v33, %v44_v3  ;;  %v282_v40 = vshrl.u32 %v3689_v4, 16  ;;  %v285_v42 = vshll.u32 %v3689_v4, 16  ;;  %v51_v3 = vld [vmem:[%s4991_s0 + $0x34] sm:$0x1] }
  0x18   :  { %2964 = vmatpush3.bf16.msra.mxu0 %v3370_v22  ;;  %v2789_v22 = vrot.slane %v3636_v33, 9  ;;  %v3390_v33 = vld [vmem:[%s4990_s1 + $0x168] sm:$0xff]   ;;  %v3754_v41 = vsel %vm3668_vm4, %v2790_v32, %v562_v34  ;;  %v2791_v57 = vrot.slane %v3689_v4, 9  ;;  %vm2181_vm0 = vcmask 785408  }
  0x19   :  { %3028 = vmatpush3.bf16.msra.mxu1 %v3371_v23  ;;  %2965 = vmatprep.subr.bf16.mxu0 %v3372_v24  ;;  %v3717_v23 = vld [vmem:[%s4991_s0 + $0x28] sm:$0xf]  ;;  %v3722_v24 = vld [vmem:[%s4991_s0 + $0x30] sm:$0xf]  ;;  %v284_v47 = vrot.slane %v282_v40, 4  ;;  %v287_v50 = vrot.slane %v285_v42, 5 }
  0x1a   :  { %3029 = vmatprep.subr.bf16.mxu1 %v3373_v25  ;;  %v3726_v25 = vsel %vm3674_vm5, %v261_v12, %v265_v6  ;;  %v2813_v39 = vcombine.low %v3717_v23, %v3722_v24  ;;  %v296_v44 = vshrl.u32 %v3717_v23, 16  ;;  %v299_v48 = vshll.u32 %v3717_v23, 16  ;;  %v3400_v40 = vld [vmem:[%s4990_s1 + $0x118] sm:$0xff]  }
  0x1b   :  { %v288_v0 = vor.u32 %v287_v50, %v284_v47  ;;  %v310_v11 = vshrl.u32 %v3722_v24, 16  ;;  %v313_v12 = vshll.u32 %v3722_v24, 16  ;;  %v59_v47 = vld [vmem:[%s4991_s0 + $0x54] sm:$0x1]  ;;  %v2794_v50 = vrot.slane %v3769_v54, 9 }
  0x1c   :  { %2966 = vmatpush3.bf16.msra.mxu0 %v3374_v26  ;;  %v2779_v26 = vcombine.low %v238_v15, %v3709_v19  ;;  %v298_v52 = vrot.slane %v296_v44, 4  ;;  %v301_v56 = vrot.slane %v299_v48, 5  ;;  %vm2747_vm1 = vcmask 517120  }
  0x1d   :  { %3030 = vmatpush3.bf16.msra.mxu1 %v3375_v27  ;;  %2967 = vmatprep.subr.bf16.mxu0 %v3376_v28  ;;  %v273_v27 = vrot.slane %v271_v18, 5  ;;  %v558_v28 = vrot.slane %v3654_v38, 5  ;;  %v289_v9 = vrot.slane %v288_v0, 4  ;;  %v319_v18 = vshll.u32 %v51_v3, 16 }
  0x1e   :  { %3031 = vmatprep.subr.bf16.mxu1 %v3377_v29  ;;  %v47_v29 = vld [vmem:[%s4991_s0 + $0x24] sm:$0x1]  ;;  %985 = vmatprep.mubr.bf16.mxu1 %v2779_v26  ;;  %v302_v5 = vor.u32 %v301_v56, %v298_v52  ;;  %v61_v52 = vld [vmem:[%s4991_s0 + $0x5c] sm:$0x1] }
  0x1f   :  { %v274_v37 = vor.u32 %v273_v27, %v270_v17  ;;  %v3744_v38 = vsel %vm3668_vm4, %v2789_v22, %v558_v28  ;;  %v291_v43 = vshll.u32 %v47_v29, 16  ;;  %v566_v58 = vrot.slane %v47_v29, 5  ;;  %v53_v17 = vld [vmem:[%s4991_s0 + $0x3c] sm:$0x1]  ;;  %v3831_v29 = vld [vmem:[%s4991_s0 + $0x60] sm:$0xf] }
  0x20   :  { %2968 = vmatpush3.bf16.msra.mxu0 %v3378_v30  ;;  %v49_v30 = vld [vmem:[%s4991_s0 + $0x2c] sm:$0x1]  ;;  %v3760_v46 = vcombine.low %v3744_v38, %v3754_v41  ;;  %v303_v15 = vrot.slane %v302_v5, 4  ;;  %v312_v27 = vrot.slane %v310_v11, 4  ;;  %v315_v28 = vrot.slane %v313_v12, 5 }
  0x21   :  { %3032 = vmatpush3.bf16.msra.mxu1 %v3379_v31  ;;  %3081 = vmatprep.subr.bf16.mxu0 %v3382_v51  ;;  %v279_v31 = vrot.slane %v277_v21, 5  ;;  %v275_v45 = vrot.slane %v274_v37, 4  ;;  %v293_v51 = vrot.slane %v291_v43, 5  ;;  %v305_v53 = vshll.u32 %v49_v30, 16  ;;  %v3401_v21 = vld [vmem:[%s4990_s1 + $0x1b8] sm:$0xff]  }
  0x22   :  { %v3795_v6 = vsel %vm3668_vm4, %v2791_v57, %v566_v58  ;;  %3145 = vmatprep.subr.bf16.mxu1 %v3399_v8  ;;  %v321_v32 = vrot.slane %v319_v18, 5  ;;  %v3844_v37 = vld [vmem:[%s4991_s0 + $0x58] sm:$0xf]  ;;  %v316_v43 = vor.u32 %v315_v28, %v312_v27  ;;  %v333_v44 = vshll.u32 %v53_v17, 16  ;;  %v3406_v28 = vld [vmem:[%s4990_s1 + $0x150] sm:$0xff]  }
  0x23   :  { %793 = vmatmul.mubr.bf16.vlgmr.msra.gmra.mxu0 %v2803_v16  ;;  %v3773_v55 = vsel %vm3674_vm5, %v275_v45, %v279_v31  ;;  %v307_v1 = vrot.slane %v305_v53, 5  ;;  %v3822_v22 = vsel %vm3674_vm5, %v289_v9, %v293_v51  ;;  %v2793_v45 = vrot.slane %v3722_v24, 9 }
  0x24   :  { %3082 = vmatpush3.bf16.msra.mxu0 %v3383_v2  ;;  %800 = vmatprep.mubr.bf16.mxu0 %v2812_v7  ;;  %v3786_v63 = vcombine.low %v3726_v25, %v3773_v55  ;;  %v2792_v2 = vrot.slane %v3717_v23, 9  ;;  %v570_v7 = vrot.slane %v49_v30, 5  ;;  %v3398_v30 = vld [vmem:[%s4990_s1 + $0x158] sm:$0xff]   ;;  %v578_v51 = vrot.slane %v53_v17, 5 }
  0x25   :  { %3083 = vmatprep.subr.bf16.mxu0 %v3386_v10  ;;  %986 = vmatmul.mubr.bf16.vlgmr.msra.gmra.mxu1 %v2771_v20  ;;  %v2814_v10 = vcombine.low %v3769_v54, %v3779_v59  ;;  %v324_v20 = vshrl.u32 %v3769_v54, 16  ;;  %v3838_v31 = vsel %vm3674_vm5, %v303_v15, %v307_v1  ;;  %v3872_v53 = vcombine.low %v3689_v4, %v3717_v23  ;;  %v3404_v23 = vld [vmem:[%s4990_s1 + $0x1b0] sm:$0xff]  }
  0x26   :  { %993 = vmatprep.mubr.bf16.mxu1 %v3786_v63  ;;  %v3810_v16 = vsel %vm3668_vm4, %v2792_v2, %v570_v7  ;;  %3146 = vmatpush3.bf16.msra.mxu1 %v3401_v21  ;;  %v3859_v42 = vcombine.low %v3822_v22, %v3838_v31  ;;  %v317_v56 = vrot.slane %v316_v43, 4  ;;  %v335_v57 = vrot.slane %v333_v44, 5 }
  0x27   :  { %v3826_v26 = vcombine.low %v3795_v6, %v3810_v16  ;;  %v326_v34 = vrot.slane %v324_v20, 4  ;;  %v2815_v58 = vcombine.low %v3844_v37, %v3831_v29  ;;  %v3883_v1 = vsel %vm3668_vm4, %v2794_v50, %v578_v51 }
  0x28   :  { %3084 = vmatpush3.bf16.msra.mxu0 %v3387_v36  ;;  %v327_v36 = vshll.u32 %v3769_v54, 16  ;;  %v3891_v2 = vsel %vm3674_vm5, %v317_v56, %v321_v32  ;;  %v347_v7 = vshll.u32 %v59_v47, 16  ;;  %v352_v11 = vshrl.u32 %v3844_v37, 16  ;;  %v3408_v56 = vld [vmem:[%s4990_s1 + $0x1e8] sm:$0xff]  }
  0x29   :  { %3085 = vmatprep.subr.bf16.mxu0 %v3390_v33  ;;  %5008 = vst [vmem:[#allocation6_spill] sm:$0xff] %v3826_v26  ;;  %v3402_v33 = vld [vmem:[%s4990_s1 + $0x1f0] sm:$0xff]   ;;  %v355_v12 = vshll.u32 %v3844_v37, 16  ;;  %v361_v15 = vshll.u32 %v61_v52, 16  ;;  %v582_v27 = vrot.slane %v59_v47, 5  ;;  %v366_v51 = vshrl.u32 %v3831_v29, 16 }
  0x2a   :  { %v329_v48 = vrot.slane %v327_v36, 5  ;;  %3147 = vmatprep.subr.bf16.mxu1 %v3402_v33  ;;  %v354_v20 = vrot.slane %v352_v11, 4  ;;  %v2796_v36 = vrot.slane %v3844_v37, 9  ;;  %v63_v33 = vld [vmem:[%s4991_s0 + $0x64] sm:$0x1] }
  0x2b   :  { %801 = vmatmul.mubr.bf16.gmra.mxu0 %v3760_v46  ;;  %3148 = vmatpush3.bf16.msra.mxu1 %v3404_v23  ;;  %v357_v21 = vrot.slane %v355_v12, 5  ;;  %v65_v47 = vld [vmem:[%s4991_s0 + $0x6c] sm:$0x1] }
  0x2c   :  { %808 = vmatprep.mubr.bf16.mxu0 %v2813_v39  ;;  %3086 = vmatpush3.bf16.msra.mxu0 %v3391_v49  ;;  %v3849_v39 = vld [vmem:[%s4991_s0 + $0x50] sm:$0xf]  ;;  %v574_v49 = vrot.slane %v51_v3, 5  ;;  %v3409_v23 = vld [vmem:[%s4990_s1 + $0x1a8] sm:$0xff]  }
  0x2d   :  { %994 = vmatmul.mubr.bf16.gmra.mxu1 %v3737_v35  ;;  %3087 = vmatprep.subr.bf16.mxu0 %v3394_v62  ;;  %v330_v62 = vor.u32 %v329_v48, %v326_v34  ;;  %v338_v4 = vshrl.u32 %v3849_v39, 16  ;;  %v341_v5 = vshll.u32 %v3849_v39, 16  ;;  %v2795_v17 = vrot.slane %v3849_v39, 9  ;;  %v3407_v48 = vld [vmem:[%s4990_s1 + $0x110] sm:$0xff]  }
  0x2e   :  { %1001 = vmatprep.mubr.bf16.mxu1 %v3859_v42  ;;  %v3879_v0 = vsel %vm3668_vm4, %v2793_v45, %v574_v49  ;;  %v363_v34 = vrot.slane %v361_v15, 5  ;;  %v358_v43 = vor.u32 %v357_v21, %v354_v20  ;;  %v586_v45 = vrot.slane %v61_v52, 5  ;;  %3149 = vmatprep.subr.bf16.mxu1 %v3408_v56  ;;  %v3412_v56 = vld [vmem:[%s4990_s1 + $0x1a0] sm:$0xff]  }
  0x2f   :  { %v3895_v3 = vcombine.low %v3879_v0, %v3883_v1  ;;  %v331_v8 = vrot.slane %v330_v62, 4  ;;  %v340_v9 = vrot.slane %v338_v4, 4  ;;  %v583_v44 = vsel %vm3668_vm4, %v2795_v17, %v582_v27  ;;  %3150 = vmatpush3.bf16.msra.mxu1 %v3409_v23 }
  0x30   :  { %3088 = vmatpush3.bf16.msra.mxu0 %v3395_v13  ;;  %v349_v13 = vrot.slane %v347_v7, 5  ;;  %v3933_v49 = vcombine.low %v3722_v24, %v3769_v54  ;;  %v369_v52 = vshll.u32 %v3831_v29, 16  ;;  %v3943_v62 = vsel %vm3668_vm4, %v2796_v36, %v586_v45  ;;  %v3948_v24 = vld [vmem:[%s4991_s0 + $0x70] sm:$0xf] }
  0x31   :  { %3089 = vmatprep.subr.bf16.mxu0 %v3398_v30  ;;  %5009 = vst [vmem:[#allocation7_spill] sm:$0xff] %v3895_v3  ;;  %v3904_v18 = vsel %vm3674_vm5, %v331_v8, %v335_v57  ;;  %v359_v57 = vrot.slane %v358_v43, 4  ;;  %v375_v54 = vshll.u32 %v63_v33, 16  ;;  %v2807_v7 = vcombine.low %v583_v44, %v3943_v62 }
  0x32   :  { %v3911_v30 = vcombine.low %v3891_v2, %v3904_v18  ;;  %v368_v8 = vrot.slane %v366_v51, 4  ;;  %v389_v20 = vshll.u32 %v65_v47, 16  ;;  %v2797_v21 = vrot.slane %v3831_v29, 9 }
  0x33   :  { %809 = vmatmul.mubr.bf16.gmra.mxu0 %v3826_v26  ;;  %v3959_v11 = vsel %vm3674_vm5, %v359_v57, %v363_v34  ;;  %v377_v12 = vrot.slane %v375_v54, 5  ;;  %v594_v34 = vrot.slane %v65_v47, 5  ;;  %v2775_v44 = vcombine.low %v3849_v39, %v3844_v37  ;;  %v67_v37 = vld [vmem:[%s4991_s0 + $0x74] sm:$0x1]  ;;  %v69_v39 = vld [vmem:[%s4991_s0 + $0x7c] sm:$0x1] }
  0x34   :  { %816 = vmatprep.mubr.bf16.mxu0 %v2814_v10  ;;  %3090 = vmatpush3.bf16.msra.mxu0 %v3400_v40  ;;  %v343_v10 = vrot.slane %v341_v5, 5  ;;  %v3917_v40 = vld [vmem:[%s4991_s0 + $0x68] sm:$0xf]  ;;  %v4003_v54 = vld [vmem:[%s4991_s0 + $0x80] sm:$0xf]  ;;  %v403_v23 = vshll.u32 %v67_v37, 16 }
  0x35   :  { %1002 = vmatmul.mubr.bf16.gmra.mxu1 %v3872_v53  ;;  %3091 = vmatprep.subr.bf16.mxu0 %v3406_v28  ;;  %v380_v4 = vshrl.u32 %v3917_v40, 16  ;;  %v383_v15 = vshll.u32 %v3917_v40, 16  ;;  %v590_v28 = vrot.slane %v63_v33, 5  ;;  %v2816_v36 = vcombine.low %v3917_v40, %v3948_v24 }
  0x36   :  { %v344_v32 = vor.u32 %v343_v10, %v340_v9  ;;  %1009 = vmatprep.mubr.bf16.mxu1 %v3911_v30  ;;  %v371_v9 = vrot.slane %v369_v52, 5  ;;  %v394_v52 = vshrl.u32 %v3948_v24, 16 }
  0x37   :  { %v382_v10 = vrot.slane %v380_v4, 4  ;;  %v385_v27 = vrot.slane %v383_v15, 5  ;;  %v3984_v47 = vsel %vm3668_vm4, %v2797_v21, %v590_v28  ;;  %v397_v4 = vshll.u32 %v3948_v24, 16 }
  0x38   :  { %v345_v50 = vrot.slane %v344_v32, 4  ;;  %3092 = vmatpush3.bf16.msra.mxu0 %v3407_v48  ;;  %v372_v17 = vor.u32 %v371_v9, %v368_v8  ;;  %v2798_v32 = vrot.slane %v3917_v40, 9  ;;  %v391_v48 = vrot.slane %v389_v20, 5 }
  0x39   :  { %v386_v45 = vor.u32 %v385_v27, %v382_v10  ;;  %v396_v8 = vrot.slane %v394_v52, 4  ;;  %v2799_v10 = vrot.slane %v3948_v24, 9  ;;  %v399_v15 = vrot.slane %v397_v4, 5  ;;  %v3417_v4 = vld [vmem:[%s4990_s1 + $0x198] sm:$0xff]  }
  0x3a   :  { %v350_v5 = vsel %vm3674_vm5, %v345_v50, %v349_v13  ;;  %v373_v43 = vrot.slane %v372_v17, 4  ;;  %v3976_v50 = vld [vmem:[%s4991_s0 + $0x78] sm:$0xf]  ;;  %v3988_v51 = vsel %vm3668_vm4, %v2798_v32, %v594_v34  ;;  %v3414_v17 = vld [vmem:[%s4990_s1 + $0x148] sm:$0xff]   ;;  %v598_v28 = vrot.slane %v67_v37, 5 }
  0x3b   :  { %817 = vmatmul.mubr.bf16.gmra.mxu0 %v3895_v3  ;;  %v2783_v13 = vcombine.low %v350_v5, %v3959_v11  ;;  %v387_v57 = vrot.slane %v386_v45, 4  ;;  %v408_v5 = vshrl.u32 %v3976_v50, 16  ;;  %v411_v9 = vshll.u32 %v3976_v50, 16  ;;  %v3415_v32 = vld [vmem:[%s4990_s1 + $0x108] sm:$0xff]   ;;  %3093 = vmatprep.subr.bf16.mxu0 %v3414_v17  ;;  %v3416_v37 = vld [vmem:[%s4990_s1 + $0x1d8] sm:$0xff]  }
  0x3c   :  { %824 = vmatprep.mubr.bf16.mxu0 %v2815_v58  ;;  %v3410_v58 = vld [vmem:[%s4990_s1 + $0x1e0] sm:$0xff]   ;;  %v3980_v33 = vsel %vm3674_vm5, %v373_v43, %v377_v12  ;;  %v417_v12 = vshll.u32 %v69_v39, 16  ;;  %v4025_v34 = vcombine.low %v3984_v47, %v3988_v51  ;;  %v2800_v43 = vrot.slane %v3976_v50, 9  ;;  %3094 = vmatpush3.bf16.msra.mxu0 %v3415_v32 }
  0x3d   :  { %1010 = vmatmul.mubr.bf16.gmra.mxu1 %v3933_v49  ;;  %3151 = vmatprep.subr.bf16.mxu1 %v3410_v58  ;;  %v405_v58 = vrot.slane %v403_v23, 5  ;;  %v413_v21 = vrot.slane %v411_v9, 5  ;;  %v602_v45 = vrot.slane %v69_v39, 5  ;;  %v422_v52 = vshrl.u32 %v4003_v54, 16 }
  0x3e   :  { %1017 = vmatprep.mubr.bf16.mxu1 %v2783_v13  ;;  %3152 = vmatpush3.bf16.msra.mxu1 %v3412_v56  ;;  %v410_v13 = vrot.slane %v408_v5, 4  ;;  %v419_v27 = vrot.slane %v417_v12, 5  ;;  %5010 = vst [vmem:[#allocation8_spill] sm:$0xff] %v4025_v34  ;;  %v4048_v23 = vcombine.low %v3831_v29, %v3917_v40  ;;  %v72_v12 = vld [vmem:[%s4991_s0 + $0x88] sm:$0xf]  ;;  %v425_v17 = vshll.u32 %v4003_v54, 16 }
  0x3f   :  { %v4041_v39 = vsel %vm3668_vm4, %v2800_v43, %v602_v45  ;;  %3153 = vmatprep.subr.bf16.mxu1 %v3416_v37  ;;  %v4064_v29 = vld [vmem:[%s4991_s0 + $0x90] sm:$0xf]  ;;  %v71_v40 = vld [vmem:[%s4991_s0 + $0x84] sm:$0x1]  ;;  %v436_v32 = vshrl.u32 %v72_v12, 16 }
  0x40   :  { %v427_v43 = vrot.slane %v425_v17, 5  ;;  %v3422_v17 = vld [vmem:[%s4990_s1 + $0x140] sm:$0xff]  }
  0x41   :  { %3095 = vmatprep.subr.bf16.mxu0 %v3422_v17  ;;  %v4177_v17 = vld [vmem:[%s4991_s0 + $0x4c] sm:$0x1] }
  0x42   :  { %3154 = vmatpush3.bf16.msra.mxu1 %v3417_v4  ;;  %v2802_v4 = vrot.slane %v72_v12, 9  ;;  %v1588_v61 = vrot.slane %v4177_v17, 5 }
  0x43   :  { %825 = vmatmul.mubr.bf16.gmra.mxu0 %v2807_v7  ;;  %v4011_v7 = vsel %vm3674_vm5, %v387_v57, %v391_v48  ;;  %v414_v48 = vor.u32 %v413_v21, %v410_v13  ;;  %v4037_v57 = vsel %vm3668_vm4, %v2799_v10, %v598_v28  ;;  %v424_v13 = vrot.slane %v422_v52, 4 }
  0x44   :  { %832 = vmatprep.mubr.bf16.mxu0 %v2816_v36  ;;  %v4018_v20 = vcombine.low %v3980_v33, %v4011_v7  ;;  %v400_v36 = vor.u32 %v399_v15, %v396_v8  ;;  %v3418_v8 = vld [vmem:[%s4990_s1 + $0x1d0] sm:$0xff]   ;;  %v4075_v15 = vcombine.low %v4037_v57, %v4041_v39  ;;  %v431_v28 = vshll.u32 %v71_v40, 16 }
  0x45   :  { %1018 = vmatmul.mubr.bf16.gmra.mxu1 %v2775_v44  ;;  %v2817_v44 = vcombine.low %v3976_v50, %v4003_v54  ;;  %v415_v5 = vrot.slane %v414_v48, 4  ;;  %3155 = vmatprep.subr.bf16.mxu1 %v3418_v8  ;;  %v606_v48 = vrot.slane %v71_v40, 5  ;;  %v438_v52 = vrot.slane %v436_v32, 4  ;;  %v3423_v40 = vld [vmem:[%s4990_s1 + $0x100] sm:$0xff]  }
  0x46   :  { %1025 = vmatprep.mubr.bf16.mxu1 %v4018_v20  ;;  %v401_v56 = vrot.slane %v400_v36, 4  ;;  %v3420_v36 = vld [vmem:[%s4990_s1 + $0x190] sm:$0xff]   ;;  %v433_v37 = vrot.slane %v431_v28, 5  ;;  %v428_v8 = vor.u32 %v427_v43, %v424_v13  ;;  %v4100_v28 = vcombine.low %v3948_v24, %v3976_v50  ;;  %v3424_v13 = vld [vmem:[%s4990_s1 + $0x1c8] sm:$0xff]   ;;  %3096 = vmatpush3.bf16.msra.mxu0 %v3423_v40 }
  0x47   :  { %v4071_v10 = vsel %vm3674_vm5, %v415_v5, %v419_v27  ;;  %v439_v27 = vshll.u32 %v72_v12, 16  ;;  %3156 = vmatpush3.bf16.msra.mxu1 %v3420_v36  ;;  %v2818_v5 = vcombine.low %v72_v12, %v4064_v29  ;;  %v2854_v40 = vcombine.low %v3773_v55, %v3822_v22 }
  0x48   :  { %v4056_v9 = vsel %vm3674_vm5, %v401_v56, %v405_v58  ;;  %v73_v58 = vld [vmem:[%s4991_s0 + $0x8c] sm:$0x1]  ;;  %v429_v32 = vrot.slane %v428_v8, 4  ;;  %3157 = vmatprep.subr.bf16.mxu1 %v3424_v13 }
  0x49   :  { %v4083_v21 = vcombine.low %v4056_v9, %v4071_v10  ;;  %v445_v45 = vshll.u32 %v73_v58, 16  ;;  %v441_v56 = vrot.slane %v439_v27, 5  ;;  %v610_v3 = vrot.slane %v73_v58, 5  ;;  %v3425_v27 = vld [vmem:[%s4990_s1 + $0x188] sm:$0xff]  }
  0x4a   :  { %v4111_v36 = vsel %vm3674_vm5, %v429_v32, %v433_v37  ;;  %v4147_v37 = vcombine.low %v4003_v54, %v72_v12  ;;  %v2863_v32 = vcombine.low %v3810_v16, %v3879_v0 }
  0x4b   :  { %833 = vmatmul.mubr.bf16.gmra.mxu0 %v4025_v34  ;;  %v447_v34 = vrot.slane %v445_v45, 5  ;;  %v442_v26 = vor.u32 %v441_v56, %v438_v52  ;;  %v4119_v50 = vsel %vm3668_vm4, %v2802_v4, %v610_v3  ;;  %v3428_v3 = vld [vmem:[%s4992_s2 + $0x38] sm:$0xff]   ;;  %3158 = vmatpush3.bf16.msra.mxu1 %v3425_v27  ;;  %v4153_v52 = vld [vmem:[%s4991_s0 + $0x48] sm:$0xf]  ;;  %v2853_v56 = vcombine.low %v3709_v19, %v3726_v25 }
  0x4c   :  { %840 = vmatprep.mubr.bf16.mxu0 %v2817_v44  ;;  %v2801_v44 = vrot.slane %v4003_v54, 9  ;;  %3269 = vmatprep.subr.bf16.mxu0 %v3428_v3  ;;  %v1054_v54 = vshll.u32 %v3779_v59, 16  ;;  %v1334_v12 = vshrl.u32 %v4153_v52, 16  ;;  %v1337_v4 = vshll.u32 %v4153_v52, 16 }
  0x4d   :  { %1026 = vmatmul.mubr.bf16.gmra.mxu1 %v4048_v23  ;;  %v443_v58 = vrot.slane %v442_v26, 4  ;;  %v3426_v26 = vld [vmem:[%s4990_s1 + $0x1c0] sm:$0xff]  }
  0x4e   :  { %1033 = vmatprep.mubr.bf16.mxu1 %v4083_v21  ;;  %v4115_v24 = vsel %vm3668_vm4, %v2801_v44, %v606_v48  ;;  %3159 = vmatprep.subr.bf16.mxu1 %v3426_v26  ;;  %v2861_v48 = vcombine.low %v3702_v14, %v3744_v38  ;;  %v2862_v14 = vcombine.low %v3754_v41, %v3795_v6  ;;  %v1051_v38 = vshrl.u32 %v3779_v59, 16  ;;  %v3430_v41 = vld [vmem:[%s4992_s2 + $0x28] sm:$0xff]   ;;  %v55_v6 = vld [vmem:[%s4991_s0 + $0x44] sm:$0x1] }
  0x4f   :  { %v4126_v43 = vsel %vm3674_vm5, %v443_v58, %v447_v34  ;;  %v4138_v44 = vcombine.low %v4115_v24, %v4119_v50  ;;  %v3427_v34 = vld [vmem:[%s4990_s1 + $0x180] sm:$0xff]   ;;  %v1056_v25 = vrot.slane %v1054_v54, 5  ;;  %v1339_v8 = vrot.slane %v1337_v4, 5 }
  0x50   :  { %v4131_v45 = vcombine.low %v4111_v36, %v4126_v43  ;;  %3160 = vmatpush3.bf16.msra.mxu1 %v3427_v34  ;;  %v1053_v19 = vrot.slane %v1051_v38, 4  ;;  %v1060_v58 = vshll.u32 %v55_v6, 16  ;;  %v1343_v26 = vshll.u32 %v4177_v17, 16 }
  0x51   :  { %v1082_v34 = vrot.slane %v55_v6, 5  ;;  %v2885_v4 = vcombine.low %v3779_v59, %v4153_v52 }
  0x52   :  { %v1057_v13 = vor.u32 %v1056_v25, %v1053_v19  ;;  %v1062_v22 = vrot.slane %v1060_v58, 5 }
  0x53   :  { %841 = vmatmul.mubr.bf16.gmra.mxu0 %v4075_v15 }
  0x54   :  { %848 = vmatprep.mubr.bf16.mxu0 %v2818_v5  ;;  %v3429_v5 = vld [vmem:[%s4992_s2 + $0x30] sm:$0xff]   ;;  %v1058_v55 = vrot.slane %v1057_v13, 4  ;;  %v2852_v13 = vrot.slane %v4064_v29, 9 }
  0x55   :  { %1034 = vmatmul.mubr.bf16.gmra.mxu1 %v4100_v28 }
  0x56   :  { %1041 = vmatprep.mubr.bf16.mxu1 %v4131_v45  ;;  %v1063_v38 = vsel %vm3674_vm5, %v1058_v55, %v1062_v22 }
  0x5b   :  { %849 = vmatmul.mubr.bf16.gmra.mxu0 %v4138_v44 }
  0x5c   :  { %1252 = vmatprep.mubr.bf16.mxu0 %v2861_v48  ;;  %v3433_v48 = vld [vmem:[%s4992_s2 + $0x18] sm:$0xff]  }
  0x5d   :  { %1042 = vmatmul.mubr.bf16.gmra.mxu1 %v4147_v37 }
  0x5e   :  { %1503 = vmatprep.mubr.bf16.mxu1 %v3786_v63  ;;  %v1336_v63 = vrot.slane %v1334_v12, 4 }
  0x60   :  { %v1340_v27 = vor.u32 %v1339_v8, %v1336_v63 }
  0x62   :  { %v1341_v16 = vrot.slane %v1340_v27, 4 }
  0x63   :  { %1253 = vmatmul.mubr.bf16.vlgmr.msra.gmra.mxu0 %v2853_v56  ;;  %v2855_v56 = vcombine.low %v3838_v31, %v3891_v2  ;;  %v3435_v31 = vld [vmem:[%s4992_s2 + $0x8] sm:$0xff]   ;;  %v2865_v2 = vcombine.low %v3943_v62, %v3984_v47  ;;  %v2866_v62 = vcombine.low %v3988_v51, %v4037_v57  ;;  %v1068_v47 = vshll.u32 %v4064_v29, 16  ;;  %v77_v51 = vld [vmem:[%s4991_s0 + $0x9c] sm:$0x1] }
  0x64   :  { %3270 = vmatpush3.bf16.msra.mxu0 %v3428_v3  ;;  %1260 = vmatprep.mubr.bf16.mxu0 %v2862_v14  ;;  %v2851_v3 = vrot.slane %v3779_v59, 9  ;;  %v1065_v59 = vshrl.u32 %v4064_v29, 16  ;;  %v2867_v57 = vcombine.low %v4041_v39, %v4115_v24  ;;  %v2859_v39 = vcombine.low %v4071_v10, %v4111_v36 }
  0x65   :  { %3271 = vmatprep.subr.bf16.mxu0 %v3429_v5  ;;  %1504 = vmatmul.mubr.bf16.vlgmr.msra.gmra.mxu1 %v3737_v35  ;;  %v3431_v35 = vld [vmem:[%s4992_s2 + $0x20] sm:$0xff]   ;;  %v1070_v63 = vrot.slane %v1068_v47, 5  ;;  %v2905_v36 = vrot.slane %v4153_v52, 9 }
  0x66   :  { %1511 = vmatprep.mubr.bf16.mxu1 %v3859_v42  ;;  %v1345_v42 = vrot.slane %v1343_v26, 5  ;;  %v4192_v0 = vsel %vm3668_vm4, %v2851_v3, %v1082_v34  ;;  %v1067_v25 = vrot.slane %v1065_v59, 4 }
  0x67   :  { %v2864_v14 = vcombine.low %v3883_v1, %v4192_v0  ;;  %v2856_v1 = vcombine.low %v3904_v18, %v1063_v38  ;;  %v4225_v18 = vld [vmem:[%s4991_s0 + $0x98] sm:$0xf] }
  0x68   :  { %3272 = vmatpush3.bf16.msra.mxu0 %v3429_v5  ;;  %v1346_v54 = vsel %vm3674_vm5, %v1341_v16, %v1345_v42  ;;  %v1348_v5 = vshrl.u32 %v4225_v18, 16  ;;  %v1351_v19 = vshll.u32 %v4225_v18, 16  ;;  %v2886_v10 = vcombine.low %v4064_v29, %v4225_v18 }
  0x69   :  { %3273 = vmatprep.subr.bf16.mxu0 %v3430_v41  ;;  %v2887_v12 = vcombine.low %v1063_v38, %v1346_v54  ;;  %v2906_v29 = vrot.slane %v4225_v18, 9 }
  0x6a   :  { %v1350_v8 = vrot.slane %v1348_v5, 4 }
  0x6b   :  { %1261 = vmatmul.mubr.bf16.gmra.mxu0 %v2854_v40 }
  0x6c   :  { %1268 = vmatprep.mubr.bf16.mxu0 %v2863_v32  ;;  %3274 = vmatpush3.bf16.msra.mxu0 %v3430_v41  ;;  %v1071_v41 = vor.u32 %v1070_v63, %v1067_v25  ;;  %v1357_v32 = vshll.u32 %v77_v51, 16 }
  0x6d   :  { %3275 = vmatprep.subr.bf16.mxu0 %v3431_v35  ;;  %1512 = vmatmul.mubr.bf16.gmra.mxu1 %v3872_v53  ;;  %v3434_v53 = vld [vmem:[%s4992_s2 + $0x10] sm:$0xff]  }
  0x6e   :  { %1519 = vmatprep.mubr.bf16.mxu1 %v3911_v30  ;;  %v3436_v30 = vld [vmem:[%s4992_s2] sm:$0xff]   ;;  %v1072_v27 = vrot.slane %v1071_v41, 4  ;;  %v1359_v3 = vrot.slane %v1357_v32, 5 }
  0x70   :  { %3276 = vmatpush3.bf16.msra.mxu0 %v3431_v35  ;;  %v5013_v35 = vld [vmem:[#allocation8_spill] sm:$0xff] }
  0x71   :  { %3277 = vmatprep.subr.bf16.mxu0 %v3433_v48 }
  0x73   :  { %1269 = vmatmul.mubr.bf16.gmra.mxu0 %v2855_v56 }
  0x74   :  { %1276 = vmatprep.mubr.bf16.mxu0 %v2864_v14  ;;  %3278 = vmatpush3.bf16.msra.mxu0 %v3433_v48 }
  0x75   :  { %3279 = vmatprep.subr.bf16.mxu0 %v3434_v53  ;;  %1520 = vmatmul.mubr.bf16.gmra.mxu1 %v3933_v49  ;;  %v2857_v49 = vcombine.low %v3959_v11, %v3980_v33  ;;  %v1353_v11 = vrot.slane %v1351_v19, 5  ;;  %v75_v33 = vld [vmem:[%s4991_s0 + $0x94] sm:$0x1] }
  0x76   :  { %1527 = vmatprep.mubr.bf16.mxu1 %v2887_v12  ;;  %v1074_v6 = vshll.u32 %v75_v33, 16  ;;  %v1086_v58 = vrot.slane %v75_v33, 5 }
  0x77   :  { %v1354_v40 = vor.u32 %v1353_v11, %v1350_v8 }
  0x78   :  { %3280 = vmatpush3.bf16.msra.mxu0 %v3434_v53  ;;  %v1076_v26 = vrot.slane %v1074_v6, 5 }
  0x79   :  { %3281 = vmatprep.subr.bf16.mxu0 %v3435_v31 }
  0x7b   :  { %1277 = vmatmul.mubr.bf16.gmra.mxu0 %v2856_v1 }
  0x7c   :  { %1284 = vmatprep.mubr.bf16.mxu0 %v2865_v2  ;;  %3282 = vmatpush3.bf16.msra.mxu0 %v3435_v31 }
  0x7d   :  { %3283 = vmatprep.subr.bf16.mxu0 %v3436_v30  ;;  %1528 = vmatmul.mubr.bf16.gmra.mxu1 %v2885_v4 }
  0x7e   :  { %1535 = vmatprep.mubr.bf16.mxu1 %v4018_v20  ;;  %v2858_v20 = vcombine.low %v4011_v7, %v4056_v9  ;;  %v1087_v7 = vsel %vm3668_vm4, %v2852_v13, %v1086_v58 }
  0x7f   :  { %v2868_v9 = vcombine.low %v4119_v50, %v1087_v7  ;;  %v5011_v50 = vld [vmem:[#allocation6_spill] sm:$0xff] }
  0x80   :  { %3284 = vmatpush3.bf16.msra.mxu0 %v3436_v30 }
  0x83   :  { %1285 = vmatmul.mubr.bf16.gmra.mxu0 %v2857_v49 }
  0x84   :  { %1292 = vmatprep.mubr.bf16.mxu0 %v2866_v62 }
  0x85   :  { %1536 = vmatmul.mubr.bf16.gmra.mxu1 %v4048_v23  ;;  %v1355_v23 = vrot.slane %v1354_v40, 4 }
  0x86   :  { %1543 = vmatprep.mubr.bf16.mxu1 %v4083_v21  ;;  %v1077_v21 = vsel %vm3674_vm5, %v1072_v27, %v1076_v26 }
  0x87   :  { %v1360_v24 = vsel %vm3674_vm5, %v1355_v23, %v1359_v3 }
  0x88   :  { %v2888_v34 = vcombine.low %v1077_v21, %v1360_v24 }
  0x8b   :  { %1293 = vmatmul.mubr.bf16.gmra.mxu0 %v2858_v20 }
  0x8c   :  { %1300 = vmatprep.mubr.bf16.mxu0 %v2867_v57 }
  0x8d   :  { %1544 = vmatmul.mubr.bf16.gmra.mxu1 %v4100_v28  ;;  %v2860_v28 = vcombine.low %v4126_v43, %v1077_v21 }
  0x8e   :  { %1551 = vmatprep.mubr.bf16.mxu1 %v4131_v45  ;;  %v5012_v45 = vld [vmem:[#allocation7_spill] sm:$0xff] }
  0x93   :  { %1301 = vmatmul.mubr.bf16.gmra.mxu0 %v2859_v39 }
  0x94   :  { %1308 = vmatprep.mubr.bf16.mxu0 %v2868_v9 }
  0x95   :  { %1552 = vmatmul.mubr.bf16.gmra.mxu1 %v4147_v37  ;;  %v1589_v37 = vsel %vm3668_vm4, %v2905_v36, %v1588_v61 }
  0x96   :  { %1559 = vmatprep.mubr.bf16.mxu1 %v2888_v34  ;;  %v2907_v43 = vcombine.low %v4192_v0, %v1589_v37 }
  0x9b   :  { %1309 = vmatmul.mubr.bf16.gmra.mxu0 %v2860_v28 }
  0x9c   :  { %3285 = vmatprep.mubr.bf16.mxu0 %v3760_v46  ;;  %v1592_v46 = vrot.slane %v77_v51, 5 }
  0x9d   :  { %1560 = vmatmul.mubr.bf16.gmra.mxu1 %v2886_v10 }
  0x9e   :  { %v1593_v52 = vsel %vm3668_vm4, %v2906_v29, %v1592_v46 }
  0x9f   :  { %v2908_v17 = vcombine.low %v1087_v7, %v1593_v52 }
  0xa3   :  { %3286 = vmatmul.mubr.bf16.vlgmr.msra.gmra.mxu0 %v5011_v50 }
  0xa4   :  { %3289 = vmatprep.mubr.bf16.mxu0 %v5012_v45 }
  0xab   :  { %3290 = vmatmul.mubr.bf16.gmra.mxu0 %v2907_v43 }
  0xac   :  { %3293 = vmatprep.mubr.bf16.mxu0 %v5013_v35 }
  0xb3   :  { %3294 = vmatmul.mubr.bf16.gmra.mxu0 %v4075_v15 }
  0xb4   :  { %3297 = vmatprep.mubr.bf16.mxu0 %v4138_v44 }
  0xbb   :  { %3298 = vmatmul.mubr.bf16.gmra.mxu0 %v2908_v17 }
  0xe3   :  { %v2969_v55 = vpop.f32.mrf.mxu0 }
  0xe5   :  { %v2970_v22 = vpop.f32.mrf.mxu0  ;;  %v3033_v16 = vpop.f32.mrf.mxu1 }
  0xe6   :  { %v2971_v42 = vadd.f32 %v2970_v22, %v2969_v55 }
  0xe7   :  { %v2972_v0 = vpop.f32.mrf.mxu0  ;;  %v3034_v48 = vpop.f32.mrf.mxu1 }
  0xe8   :  { %v3035_v56 = vadd.f32 %v3034_v48, %v3033_v16 }
  0xe9   :  { %v2973_v14 = vpop.f32.mrf.mxu0  ;;  %v3036_v38 = vpop.f32.mrf.mxu1 }
  0xea   :  { %v2974_v54 = vadd.f32 %v2973_v14, %v2972_v0  ;;  %v4278_v53 = vadd.f32 %v3035_v56, %v2971_v42 }
  0xeb   :  { %v2975_v15 = vpop.f32.mrf.mxu0  ;;  %v3037_v12 = vpop.f32.mrf.mxu1 }
  0xec   :  { %v3038_v44 = vadd.f32 %v3037_v12, %v3036_v38 }
  0xed   :  { %v2976_v31 = vpop.f32.mrf.mxu0  ;;  %v3039_v60 = vpop.f32.mrf.mxu1 }
  0xee   :  { %v2977_v1 = vadd.f32 %v2976_v31, %v2975_v15  ;;  %v4280_v2 = vadd.f32 %v3038_v44, %v2974_v54 }
  0xef   :  { %v2978_v30 = vpop.f32.mrf.mxu0  ;;  %v3040_v4 = vpop.f32.mrf.mxu1 }
  0xf0   :  { %v3041_v18 = vadd.f32 %v3040_v4, %v3039_v60 }
  0xf1   :  { %v2979_v49 = vpop.f32.mrf.mxu0  ;;  %v3042_v62 = vpop.f32.mrf.mxu1 }
  0xf2   :  { %v2980_v59 = vadd.f32 %v2979_v49, %v2978_v30  ;;  %v4282_v47 = vadd.f32 %v3041_v18, %v2977_v1 }
  0xf3   :  { %v2981_v5 = vpop.f32.mrf.mxu0  ;;  %v3043_v19 = vpop.f32.mrf.mxu1 }
  0xf4   :  { %v3044_v25 = vadd.f32 %v3043_v19, %v3042_v62 }
  0xf5   :  { %v2982_v63 = vpop.f32.mrf.mxu0  ;;  %v3045_v8 = vpop.f32.mrf.mxu1 }
  0xf6   :  { %v2983_v11 = vadd.f32 %v2982_v63, %v2981_v5  ;;  %v4284_v33 = vadd.f32 %v3044_v25, %v2980_v59 }
  0xf7   :  { %v2984_v51 = vpop.f32.mrf.mxu0  ;;  %v3046_v20 = vpop.f32.mrf.mxu1 }
  0xf8   :  { %v3047_v57 = vadd.f32 %v3046_v20, %v3045_v8 }
  0xf9   :  { %v2985_v41 = vpop.f32.mrf.mxu0  ;;  %v3048_v6 = vpop.f32.mrf.mxu1 }
  0xfa   :  { %v2986_v40 = vadd.f32 %v2985_v41, %v2984_v51  ;;  %v4286_v32 = vadd.f32 %v3047_v57, %v2983_v11 }
  0xfb   :  { %v2987_v13 = vpop.f32.mrf.mxu0  ;;  %v3049_v58 = vpop.f32.mrf.mxu1 }
  0xfc   :  { %v3050_v27 = vadd.f32 %v3049_v58, %v3048_v6 }
  0xfd   :  { %v2988_v26 = vpop.f32.mrf.mxu0  ;;  %v3051_v23 = vpop.f32.mrf.mxu1 }
  0xfe   :  { %v2989_v3 = vadd.f32 %v2988_v26, %v2987_v13  ;;  %v4288_v7 = vadd.f32 %v3050_v27, %v2986_v40 }
  0xff   :  { %v2990_v39 = vpop.f32.mrf.mxu0  ;;  %v3052_v9 = vpop.f32.mrf.mxu1 }
 0x100   :  { %v3053_v21 = vadd.f32 %v3052_v9, %v3051_v23 }
 0x101   :  { %v2991_v24 = vpop.f32.mrf.mxu0  ;;  %v3054_v34 = vpop.f32.mrf.mxu1 }
 0x102   :  { %v2992_v28 = vadd.f32 %v2991_v24, %v2990_v39  ;;  %v4290_v10 = vadd.f32 %v3053_v21, %v2989_v3 }
 0x103   :  { %v2993_v36 = vpop.f32.mrf.mxu0  ;;  %v3055_v61 = vpop.f32.mrf.mxu1 }
 0x104   :  { %5014 = vst [vmem:[#allocation6_spill] sm:$0xff] %v4290_v10  ;;  %v3056_v50 = vadd.f32 %v3055_v61, %v3054_v34 }
 0x105   :  { %v2994_v45 = vpop.f32.mrf.mxu0  ;;  %v3057_v37 = vpop.f32.mrf.mxu1 }
 0x106   :  { %v2995_v43 = vadd.f32 %v2994_v45, %v2993_v36  ;;  %v4292_v35 = vadd.f32 %v3056_v50, %v2992_v28 }
 0x107   :  { %v2996_v29 = vpop.f32.mrf.mxu0  ;;  %v3058_v46 = vpop.f32.mrf.mxu1 }
 0x108   :  { %5015 = vst [vmem:[#allocation7_spill] sm:$0xff] %v4292_v35  ;;  %v3059_v52 = vadd.f32 %v3058_v46, %v3057_v37 }
 0x109   :  { %v2997_v17 = vpop.f32.mrf.mxu0  ;;  %v3060_v55 = vpop.f32.mrf.mxu1 }
 0x10a   :  { %v2998_v22 = vadd.f32 %v2997_v17, %v2996_v29  ;;  %v4294_v16 = vadd.f32 %v3059_v52, %v2995_v43 }
 0x10b   :  { %v2999_v42 = vpop.f32.mrf.mxu0  ;;  %v3061_v0 = vpop.f32.mrf.mxu1 }
 0x10c   :  { %5016 = vst [vmem:[#allocation8_spill] sm:$0xff] %v4294_v16  ;;  %v3062_v48 = vadd.f32 %v3061_v0, %v3060_v55 }
 0x10d   :  { %v3000_v56 = vpop.f32.mrf.mxu0  ;;  %v3063_v14 = vpop.f32.mrf.mxu1 }
 0x10e   :  { %v3001_v38 = vadd.f32 %v3000_v56, %v2999_v42  ;;  %v4296_v54 = vadd.f32 %v3062_v48, %v2998_v22  ;;  %v3472_v42 = vmov 0.0  }
 0x10f   :  { %v3002_v15 = vpop.f32.mrf.mxu0  ;;  %v3064_v12 = vpop.f32.mrf.mxu1  ;;  %1880 = vst.msk [vmem:[#allocation3] sm:$0x1] %vm1879_vm6, %v3472_v42  ;;  %1881 = vst.msk [vmem:[#allocation4] sm:$0x1] %vm1879_vm6, %v3472_v42 }
 0x110   :  { %5017 = vst [vmem:[#allocation9_spill] sm:$0xff] %v4296_v54  ;;  %v3065_v44 = vadd.f32 %v3064_v12, %v3063_v14 }
 0x111   :  { %v3003_v31 = vpop.f32.mrf.mxu0  ;;  %v3066_v60 = vpop.f32.mrf.mxu1 }
 0x112   :  { %v3004_v1 = vadd.f32 %v3003_v31, %v3002_v15  ;;  %v4298_v30 = vadd.f32 %v3065_v44, %v3001_v38 }
 0x113   :  { %v3005_v4 = vpop.f32.mrf.mxu0  ;;  %v3067_v18 = vpop.f32.mrf.mxu1 }
 0x114   :  { %5018 = vst [vmem:[#allocation10_spill] sm:$0xff] %v4298_v30  ;;  %v3068_v49 = vadd.f32 %v3067_v18, %v3066_v60 }
 0x115   :  { %v3006_v62 = vpop.f32.mrf.mxu0  ;;  %v3069_v59 = vpop.f32.mrf.mxu1 }
 0x116   :  { %v3007_v5 = vadd.f32 %v3006_v62, %v3005_v4  ;;  %v4300_v19 = vadd.f32 %v3068_v49, %v3004_v1 }
 0x117   :  { %v3008_v25 = vpop.f32.mrf.mxu0  ;;  %v3070_v63 = vpop.f32.mrf.mxu1 }
 0x118   :  { %5019 = vst [vmem:[#allocation11_spill] sm:$0xff] %v4300_v19  ;;  %v3071_v8 = vadd.f32 %v3070_v63, %v3069_v59 }
 0x119   :  { %v3009_v11 = vpop.f32.mrf.mxu0  ;;  %v3072_v51 = vpop.f32.mrf.mxu1 }
 0x11a   :  { %v3010_v20 = vadd.f32 %v3009_v11, %v3008_v25  ;;  %v4302_v57 = vadd.f32 %v3071_v8, %v3007_v5 }
 0x11b   :  { %v3011_v41 = vpop.f32.mrf.mxu0  ;;  %v3073_v6 = vpop.f32.mrf.mxu1 }
 0x11c   :  { %5020 = vst [vmem:[#allocation12_spill] sm:$0xff] %v4302_v57  ;;  %v3074_v40 = vadd.f32 %v3073_v6, %v3072_v51 }
 0x11d   :  { %v3012_v13 = vpop.f32.mrf.mxu0  ;;  %v3075_v58 = vpop.f32.mrf.mxu1 }
 0x11e   :  { %v3013_v27 = vadd.f32 %v3012_v13, %v3011_v41  ;;  %v4304_v26 = vadd.f32 %v3074_v40, %v3010_v20 }
 0x11f   :  { %v3014_v23 = vpop.f32.mrf.mxu0  ;;  %v3076_v3 = vpop.f32.mrf.mxu1 }
 0x120   :  { %5021 = vst [vmem:[#allocation13_spill] sm:$0xff] %v4304_v26  ;;  %v3077_v39 = vadd.f32 %v3076_v3, %v3075_v58 }
 0x121   :  { %v3015_v9 = vpop.f32.mrf.mxu0  ;;  %v4306_v21 = vpop.f32.mrf.mxu1 }
 0x122   :  { %v4308_v24 = vadd.f32 %v3015_v9, %v3014_v23  ;;  %v4310_v34 = vadd.f32 %v3077_v39, %v3013_v27 }
 0x123   :  { %v3097_v28 = vpop.f32.mrf.mxu0  ;;  %v3079_v36 = vpop.f32.mrf.mxu1 }
 0x124   :  { %5022 = vst [vmem:[#allocation14_spill] sm:$0xff] %v4310_v34  ;;  %v3080_v16 = vadd.f32 %v3079_v36, %v4306_v21 }
 0x125   :  { %v3098_v61 = vpop.f32.mrf.mxu0  ;;  %v3161_v45 = vpop.f32.mrf.mxu1 }
 0x126   :  { %v3099_v50 = vadd.f32 %v3098_v61, %v3097_v28  ;;  %v1047_v21 = vadd.f32 %v3080_v16, %v4308_v24 }
 0x127   :  { %v3100_v37 = vpop.f32.mrf.mxu0  ;;  %v3162_v29 = vpop.f32.mrf.mxu1 }
 0x128   :  { %v4313_v43 = vadd.f32 %v3099_v50, %v4278_v53 }
 0x129   :  { %v3101_v46 = vpop.f32.mrf.mxu0  ;;  %v3164_v52 = vpop.f32.mrf.mxu1 }
 0x12a   :  { %v3102_v34 = vadd.f32 %v3101_v46, %v3100_v37 }
 0x12b   :  { %v3103_v17 = vpop.f32.mrf.mxu0  ;;  %v3165_v55 = vpop.f32.mrf.mxu1 }
 0x12c   :  { %v3166_v35 = vadd.f32 %v3165_v55, %v3164_v52 }
 0x12d   :  { %v3104_v22 = vpop.f32.mrf.mxu0  ;;  %v3167_v0 = vpop.f32.mrf.mxu1 }
 0x12e   :  { %v3105_v26 = vadd.f32 %v3104_v22, %v3103_v17 }
 0x12f   :  { %v3106_v48 = vpop.f32.mrf.mxu0  ;;  %v3168_v56 = vpop.f32.mrf.mxu1 }
 0x131   :  { %v3107_v14 = vpop.f32.mrf.mxu0  ;;  %v3170_v38 = vpop.f32.mrf.mxu1 }
 0x132   :  { %v3108_v19 = vadd.f32 %v3107_v14, %v3106_v48 }
 0x133   :  { %v3109_v15 = vpop.f32.mrf.mxu0  ;;  %v3171_v53 = vpop.f32.mrf.mxu1 }
 0x134   :  { %v3172_v37 = vadd.f32 %v3171_v53, %v3170_v38 }
 0x135   :  { %v3110_v12 = vpop.f32.mrf.mxu0  ;;  %v3173_v44 = vpop.f32.mrf.mxu1 }
 0x136   :  { %v3111_v30 = vadd.f32 %v3110_v12, %v3109_v15 }
 0x137   :  { %v3112_v31 = vpop.f32.mrf.mxu0  ;;  %v3174_v60 = vpop.f32.mrf.mxu1 }
 0x138   :  { %v1321_v46 = vadd.f32 %v3111_v30, %v4286_v32  ;;  %v3175_v17 = vadd.f32 %v3174_v60, %v3173_v44 }
 0x139   :  { %v3113_v1 = vpop.f32.mrf.mxu0  ;;  %v4317_v4 = vpop.f32.mrf.mxu1 }
 0x13a   :  { %v3114_v48 = vadd.f32 %v3113_v1, %v3112_v31  ;;  %v4342_v55 = vadd.f32 %v3175_v17, %v1321_v46  ;;  %v5034_v31 = vld [vmem:[#allocation7_spill] sm:$0xff] }
 0x13b   :  { %v3115_v18 = vpop.f32.mrf.mxu0  ;;  %v4319_v49 = vpop.f32.mrf.mxu1 }
 0x13c   :  { %5023 = vst [vmem:[#allocation15_spill] sm:$0xff] %v4319_v49  ;;  %v1320_v49 = vadd.f32 %v3108_v19, %v4284_v33 }
 0x13d   :  { %v3116_v62 = vpop.f32.mrf.mxu0  ;;  %v4321_v59 = vpop.f32.mrf.mxu1 }
 0x13e   :  { %5024 = vst [vmem:[#allocation16_spill] sm:$0xff] %v4321_v59  ;;  %v3169_v59 = vadd.f32 %v3168_v56, %v3167_v0  ;;  %v3117_v14 = vadd.f32 %v3116_v62, %v3115_v18  ;;  %v1571_v30 = vadd.f32 %v3172_v37, %v1320_v49  ;;  %v1322_v0 = vadd.f32 %v3114_v48, %v4288_v7  ;;  %v5031_v56 = vld [vmem:[#allocation6_spill] sm:$0xff]  ;;  %v5044_v48 = vld [vmem:[#allocation13_spill] sm:$0xff] }
 0x13f   :  { %v3118_v5 = vpop.f32.mrf.mxu0  ;;  %v4323_v25 = vpop.f32.mrf.mxu1 }
 0x140   :  { %5025 = vst [vmem:[#allocation17_spill] sm:$0xff] %v4323_v25  ;;  %v1319_v25 = vadd.f32 %v3105_v26, %v4282_v47 }
 0x141   :  { %v3119_v63 = vpop.f32.mrf.mxu0  ;;  %v4325_v8 = vpop.f32.mrf.mxu1 }
 0x142   :  { %5026 = vst [vmem:[#allocation18_spill] sm:$0xff] %v4325_v8  ;;  %v1318_v8 = vadd.f32 %v3102_v34, %v4280_v2  ;;  %v3120_v36 = vadd.f32 %v3119_v63, %v3118_v5 }
 0x143   :  { %v3121_v11 = vpop.f32.mrf.mxu0  ;;  %v4327_v51 = vpop.f32.mrf.mxu1  ;;  %v5030_v16 = vld [vmem:[#allocation15_spill] sm:$0xff] }
 0x144   :  { %5027 = vst [vmem:[#allocation19_spill] sm:$0xff] %v4327_v51  ;;  %v3163_v51 = vadd.f32 %v3162_v29, %v3161_v45  ;;  %v1570_v29 = vadd.f32 %v3169_v59, %v1319_v25  ;;  %v4340_v52 = vadd.f32 %v3166_v35, %v1318_v8  ;;  %v3178_v24 = vadd.f32 %v5030_v16, %v4317_v4  ;;  %v5037_v25 = vld [vmem:[#allocation8_spill] sm:$0xff]  ;;  %v5039_v4 = vld [vmem:[#allocation9_spill] sm:$0xff] }
 0x145   :  { %v3122_v20 = vpop.f32.mrf.mxu0  ;;  %v4329_v41 = vpop.f32.mrf.mxu1  ;;  %v5032_v12 = vld [vmem:[#allocation16_spill] sm:$0xff]  ;;  %v1324_v60 = vadd.f32 %v3120_v36, %v5034_v31  ;;  %v5045_v36 = vld [vmem:[#allocation14_spill] sm:$0xff] }
 0x146   :  { %5028 = vst [vmem:[#allocation20_spill] sm:$0xff] %v4329_v41  ;;  %v1568_v2 = vadd.f32 %v3163_v51, %v4313_v43  ;;  %v3123_v34 = vadd.f32 %v3122_v20, %v3121_v11  ;;  %v1323_v43 = vadd.f32 %v3117_v14, %v5031_v56 }
 0x147   :  { %v3124_v6 = vpop.f32.mrf.mxu0  ;;  %v3186_v40 = vpop.f32.mrf.mxu1  ;;  %v5033_v44 = vld [vmem:[#allocation17_spill] sm:$0xff] }
 0x148   :  { %v3181_v35 = vadd.f32 %v5033_v44, %v5032_v12  ;;  %v1325_v7 = vadd.f32 %v3123_v34, %v5037_v25 }
 0x149   :  { %v3125_v13 = vpop.f32.mrf.mxu0  ;;  %v4331_v58 = vpop.f32.mrf.mxu1  ;;  %v5035_v49 = vld [vmem:[#allocation18_spill] sm:$0xff] }
 0x14a   :  { %5029 = vst [vmem:[#allocation21_spill] sm:$0xff] %v4331_v58  ;;  %v3126_v47 = vadd.f32 %v3125_v13, %v3124_v6  ;;  %v5041_v6 = vld [vmem:[#allocation10_spill] sm:$0xff] }
 0x14b   :  { %v3127_v27 = vpop.f32.mrf.mxu0  ;;  %v3189_v23 = vpop.f32.mrf.mxu1  ;;  %v5036_v59 = vld [vmem:[#allocation19_spill] sm:$0xff] }
 0x14c   :  { %v3184_v5 = vadd.f32 %v5036_v59, %v5035_v49  ;;  %v1326_v11 = vadd.f32 %v3126_v47, %v5039_v4 }
 0x14d   :  { %v3128_v3 = vpop.f32.mrf.mxu0  ;;  %v3191_v39 = vpop.f32.mrf.mxu1  ;;  %v5038_v63 = vld [vmem:[#allocation20_spill] sm:$0xff] }
 0x14e   :  { %v3129_v33 = vadd.f32 %v3128_v3, %v3127_v27  ;;  %v3187_v8 = vadd.f32 %v3186_v40, %v5038_v63  ;;  %v5042_v3 = vld [vmem:[#allocation11_spill] sm:$0xff] }
 0x14f   :  { %v3130_v9 = vpop.f32.mrf.mxu0  ;;  %v3192_v28 = vpop.f32.mrf.mxu1 }
 0x150   :  { %v1327_v13 = vadd.f32 %v3129_v33, %v5041_v6  ;;  %v3193_v27 = vadd.f32 %v3192_v28, %v3191_v39  ;;  %v4367_v33 = vadd.f32 %v3178_v24, %v1322_v0 }
 0x151   :  { %v3131_v61 = vpop.f32.mrf.mxu0  ;;  %v3194_v50 = vpop.f32.mrf.mxu1 }
 0x152   :  { %v3132_v19 = vadd.f32 %v3131_v61, %v3130_v9  ;;  %v4376_v56 = vadd.f32 %v3193_v27, %v1327_v13 }
 0x153   :  { %v3133_v42 = vpop.f32.mrf.mxu0  ;;  %v3195_v57 = vpop.f32.mrf.mxu1 }
 0x154   :  { %v1328_v9 = vadd.f32 %v3132_v19, %v5042_v3  ;;  %v3196_v61 = vadd.f32 %v3195_v57, %v3194_v50  ;;  %v1574_v50 = vadd.f32 %v3181_v35, %v1323_v43  ;;  %v1575_v19 = vadd.f32 %v3184_v5, %v1324_v60 }
 0x155   :  { %v3134_v54 = vpop.f32.mrf.mxu0  ;;  %v3197_v41 = vpop.f32.mrf.mxu1 }
 0x156   :  { %v3135_v38 = vadd.f32 %v3134_v54, %v3133_v42  ;;  %v5040_v54 = vld [vmem:[#allocation21_spill] sm:$0xff]  ;;  %v5043_v42 = vld [vmem:[#allocation12_spill] sm:$0xff] }
 0x157   :  { %v3136_v58 = vpop.f32.mrf.mxu0  ;;  %v3198_v10 = vpop.f32.mrf.mxu1  ;;  %v3190_v20 = vadd.f32 %v3189_v23, %v5040_v54  ;;  %v4365_v23 = vld [vmem:[%s4993_s3] ss:$0 sm:$0xff]  ;;  %s3473_s3 = smov 32  }
 0x158   :  { %v1329_v37 = vadd.f32 %v3135_v38, %v5043_v42  ;;  %v3199_v46 = vadd.f32 %v3198_v10, %v3197_v41 }
 0x159   :  { %v3137_v22 = vpop.f32.mrf.mxu0  ;;  %v3200_v15 = vpop.f32.mrf.mxu1 }
 0x15a   :  { %v3138_v1 = vadd.f32 %v3137_v22, %v3136_v58  ;;  %v4382_v0 = vadd.f32 %v3199_v46, %v1329_v37 }
 0x15b   :  { %v3139_v45 = vpop.f32.mrf.mxu0  ;;  %v3201_v26 = vpop.f32.mrf.mxu1 }
 0x15c   :  { %v1330_v14 = vadd.f32 %v3138_v1, %v5044_v48  ;;  %v3202_v40 = vadd.f32 %v3201_v26, %v3200_v15  ;;  %v4369_v15 = vadd.f32 %v3187_v8, %v1325_v7  ;;  %v4371_v26 = vadd.f32 %v3190_v20, %v1326_v11 }
 0x15d   :  { %v3140_v32 = vpop.f32.mrf.mxu0  ;;  %v3203_v53 = vpop.f32.mrf.mxu1 }
 0x15e   :  { %v3141_v18 = vadd.f32 %v3140_v32, %v3139_v45  ;;  %v4386_v38 = vadd.f32 %v3202_v40, %v1330_v14 }
 0x15f   :  { %v3142_v62 = vpop.f32.mrf.mxu0  ;;  %v3204_v51 = vpop.f32.mrf.mxu1 }
 0x160   :  { %v1331_v45 = vadd.f32 %v3141_v18, %v5045_v36  ;;  %v3205_v34 = vadd.f32 %v3204_v51, %v3203_v53 }
 0x161   :  { %v3143_v58 = vpop.f32.mrf.mxu0  ;;  %v3206_v22 = vpop.f32.mrf.mxu1 }
 0x162   :  { %v3144_v17 = vadd.f32 %v3143_v58, %v3142_v62  ;;  %v4380_v43 = vadd.f32 %v3205_v34, %v1331_v45 }
 0x163   :  { %v3287_v47 = vpop.f32.mrf.mxu0  ;;  %v3207_v28 = vpop.f32.mrf.mxu1 }
 0x164   :  { %v1332_v39 = vadd.f32 %v3144_v17, %v1047_v21  ;;  %v1747_v57 = vadd.f32 %v3287_v47, %v1570_v29  ;;  %v3208_v10 = vadd.f32 %v3207_v28, %v3206_v22  ;;  %v4378_v21 = vadd.f32 %v3196_v61, %v1328_v9 }
 0x165   :  { %v1682_v41 = vpop.f32.mrf.mxu0 }
 0x166   :  { %v4374_v32 = vadd.f32 %v4365_v23, %v1747_v57  ;;  %v1745_v16 = vadd.f32 %v1682_v41, %v1568_v2  ;;  %v4384_v24 = vadd.f32 %v3208_v10, %v1332_v39 }
 0x167   :  { %v3288_v29 = vpop.f32.mrf.mxu0 }
 0x168   :  { %v1788_v53 = vsel %vm1784_vm7, %v4374_v32, 0.0  ;;  %v1824_v12 = vmul.f32 %v4374_v32, %v4374_v32  ;;  %v4393_v2 = vadd.f32 %v4365_v23, %v1745_v16  ;;  %v1748_v44 = vadd.f32 %v3288_v29, %v1571_v30 }
 0x169   :  { %v1685_v35 = vpop.f32.mrf.mxu0  ;;  %v2077_v31 = vrot.slane %v4374_v32, 3  ;;  %v1944_v60 = vrot.slane %v4374_v32, 7  ;;  %v2013_v1 = vrot.slane %v4374_v32, 1  ;;  %v2111_v18 = vrot.slane %v4374_v32, 4 }
 0x16a   :  { %v1841_v62 = vsel %vm1784_vm7, %v1824_v12, 0.0  ;;  %v1785_v49 = vsel %vm1784_vm7, %v4393_v2, 0.0  ;;  %v1822_v59 = vmul.f32 %v4393_v2, %v4393_v2  ;;  %v4405_v5 = vadd.f32 %v4365_v23, %v1748_v44 }
 0x16b   :  { %v1746_v30 = vadd.f32 %v1685_v35, %v4340_v52  ;;  %v3291_v25 = vpop.f32.mrf.mxu0  ;;  %v2074_v7 = vrot.slane %v4393_v2, 5  ;;  %v1942_v63 = vrot.slane %v4393_v2, 1  ;;  %v1976_v8 = vrot.slane %v4393_v2, 2 }
 0x16c   :  { %v1838_v4 = vsel %vm1784_vm7, %v1822_v59, 0.0  ;;  %v1790_v11 = vsel %vm1784_vm7, %v4405_v5, 0.0  ;;  %v1825_v51 = vmul.f32 %v4405_v5, %v4405_v5  ;;  %v1751_v54 = vadd.f32 %v3291_v25, %v1574_v50 }
 0x16d   :  { %v4417_v20 = vadd.f32 %v4365_v23, %v1746_v30  ;;  %v1698_v52 = vpop.f32.mrf.mxu0  ;;  %v2079_v6 = vrot.slane %v4405_v5, 2  ;;  %v1946_v13 = vrot.slane %v4405_v5, 6  ;;  %v1980_v27 = vrot.slane %v4405_v5, 7 }
 0x16e   :  { %v1843_v3 = vsel %vm1784_vm7, %v1825_v51, 0.0  ;;  %v4424_v9 = vadd.f32 %v4365_v23, %v1751_v54  ;;  %v1749_v58 = vadd.f32 %v1698_v52, %v4342_v55  ;;  %v2010_v61 = vrot.slane %v4393_v2, 3 }
 0x16f   :  { %v1786_v42 = vsel %vm1784_vm7, %v4417_v20, 0.0  ;;  %v1823_v37 = vmul.f32 %v4417_v20, %v4417_v20  ;;  %v3292_v46 = vpop.f32.mrf.mxu0  ;;  %v2075_v17 = vrot.slane %v4417_v20, 4  ;;  %v4435_v22 = vsel %vm1906_vm8, %v4417_v20, %v1942_v63 }
 0x170   :  { %v1787_v48 = vadd.f32 %v1786_v42, %v1785_v49  ;;  %v1796_v55 = vsel %vm1784_vm7, %v4424_v9, 0.0  ;;  %v1828_v14 = vmul.f32 %v4424_v9, %v4424_v9  ;;  %v4442_v40 = vadd.f32 %v4365_v23, %v1749_v58 }
 0x171   :  { %v1839_v36 = vsel %vm1784_vm7, %v1823_v37, 0.0  ;;  %v1752_v45 = vadd.f32 %v3292_v46, %v1575_v19  ;;  %v1701_v34 = vpop.f32.mrf.mxu0  ;;  %v2076_v47 = vsel %vm1906_vm8, %v2075_v17, %v2074_v7  ;;  %v2084_v39 = vrot.slane %v4424_v9, 7 }
 0x172   :  { %v1789_v28 = vadd.f32 %v1788_v53, %v1787_v48  ;;  %v1840_v57 = vadd.f32 %v1839_v36, %v1838_v4  ;;  %v1849_v50 = vsel %vm1784_vm7, %v1828_v14, 0.0  ;;  %v1792_v10 = vsel %vm1784_vm7, %v4442_v40, 0.0 }
 0x173   :  { %v1826_v41 = vmul.f32 %v4442_v40, %v4442_v40  ;;  %v4453_v16 = vadd.f32 %v4365_v23, %v1752_v45  ;;  %v1750_v19 = vadd.f32 %v1701_v34, %v4367_v33  ;;  %v3295_v29 = vpop.f32.mrf.mxu0  ;;  %v2078_v12 = vsel %vm1909_vm9, %v2077_v31, %v2076_v47 }
 0x174   :  { %v1842_v44 = vadd.f32 %v1841_v62, %v1840_v57  ;;  %v1791_v35 = vadd.f32 %v1790_v11, %v1789_v28  ;;  %v1755_v53 = vadd.f32 %v3295_v29, %v4376_v56  ;;  %v2080_v49 = vsel %vm1912_vm10, %v2079_v6, %v2078_v12 }
 0x175   :  { %v1845_v59 = vsel %vm1784_vm7, %v1826_v41, 0.0  ;;  %v1798_v30 = vsel %vm1784_vm7, %v4453_v16, 0.0  ;;  %v1829_v25 = vmul.f32 %v4453_v16, %v4453_v16  ;;  %v4465_v33 = vadd.f32 %v4365_v23, %v1750_v19  ;;  %v1714_v7 = vpop.f32.mrf.mxu0 }
 0x176   :  { %v1793_v31 = vadd.f32 %v1792_v10, %v1791_v35  ;;  %v1844_v62 = vadd.f32 %v1843_v3, %v1842_v44  ;;  %v4468_v63 = vadd.f32 %v4365_v23, %v1755_v53  ;;  %v1753_v56 = vadd.f32 %v1714_v7, %v4369_v15 }
 0x177   :  { %v1851_v4 = vsel %vm1784_vm7, %v1829_v25, 0.0  ;;  %v1794_v11 = vsel %vm1784_vm7, %v4465_v33, 0.0  ;;  %v1827_v51 = vmul.f32 %v4465_v33, %v4465_v33  ;;  %v3296_v54 = vpop.f32.mrf.mxu0  ;;  %v2081_v52 = vrot.slane %v4442_v40, 1 }
 0x178   :  { %v1846_v6 = vadd.f32 %v1845_v59, %v1844_v62  ;;  %v1795_v58 = vadd.f32 %v1794_v11, %v1793_v31  ;;  %v1804_v3 = vsel %vm1784_vm7, %v4468_v63, 0.0  ;;  %v1832_v42 = vmul.f32 %v4468_v63, %v4468_v63 }
 0x179   :  { %v1847_v15 = vsel %vm1784_vm7, %v1827_v51, 0.0  ;;  %v4483_v37 = vadd.f32 %v4365_v23, %v1753_v56  ;;  %v1756_v46 = vadd.f32 %v3296_v54, %v4378_v21  ;;  %v1717_v17 = vpop.f32.mrf.mxu0  ;;  %v2082_v48 = vsel %vm1915_vm11, %v2081_v52, %v2080_v49 }
 0x17a   :  { %v1797_v14 = vadd.f32 %v1796_v55, %v1795_v58  ;;  %v1848_v36 = vadd.f32 %v1847_v15, %v1846_v6  ;;  %v1857_v45 = vsel %vm1784_vm7, %v1832_v42, 0.0  ;;  %v1754_v34 = vadd.f32 %v1717_v17, %v4371_v26 }
 0x17b   :  { %v1800_v47 = vsel %vm1784_vm7, %v4483_v37, 0.0  ;;  %v1830_v28 = vmul.f32 %v4483_v37, %v4483_v37  ;;  %v4494_v57 = vadd.f32 %v4365_v23, %v1756_v46  ;;  %v2083_v21 = vsel %vm1918_vm12, %v4465_v33, %v2082_v48  ;;  %v3299_v10 = vpop.f32.mrf.mxu0 }
 0x17c   :  { %v1850_v41 = vadd.f32 %v1849_v50, %v1848_v36  ;;  %v1799_v55 = vadd.f32 %v1798_v30, %v1797_v14  ;;  %v4499_v19 = vadd.f32 %v4365_v23, %v1754_v34  ;;  %v2085_v26 = vsel %vm1921_vm13, %v2084_v39, %v2083_v21 }
 0x17d   :  { %v1853_v29 = vsel %vm1784_vm7, %v1830_v28, 0.0  ;;  %v1806_v12 = vsel %vm1784_vm7, %v4494_v57, 0.0  ;;  %v1833_v44 = vmul.f32 %v4494_v57, %v4494_v57  ;;  %v2086_v35 = vrot.slane %v4453_v16, 6  ;;  %v1730_v31 = vpop.f32.mrf.mxu0 }
 0x17e   :  { %v1801_v53 = vadd.f32 %v1800_v47, %v1799_v55  ;;  %v1852_v49 = vadd.f32 %v1851_v4, %v1850_v41  ;;  %v1802_v50 = vsel %vm1784_vm7, %v4499_v19, 0.0  ;;  %v1831_v59 = vmul.f32 %v4499_v19, %v4499_v19 }
 0x17f   :  { %v1859_v39 = vsel %vm1784_vm7, %v1833_v44, 0.0  ;;  %v2087_v30 = vsel %vm1924_vm14, %v2086_v35, %v2085_v26  ;;  %v1759_v25 = vadd.f32 %v3299_v10, %v4380_v43  ;;  %v1945_v7 = vsel %vm1909_vm9, %v1944_v60, %v4435_v22  ;;  %v3300_v36 = vpop.f32.mrf.mxu0 }
 0x180   :  { %v1854_v62 = vadd.f32 %v1853_v29, %v1852_v49  ;;  %v1803_v56 = vadd.f32 %v1802_v50, %v1801_v53  ;;  %v1855_v4 = vsel %vm1784_vm7, %v1831_v59, 0.0  ;;  %2102 = vrot.lane.b32.xlu0 %v2087_v30, %s3473_s3  ;;  %v1947_v11 = vsel %vm1912_vm10, %v1946_v13, %v1945_v7 }
 0x181   :  { %v4525_v51 = vadd.f32 %v4365_v23, %v1759_v25  ;;  %v1948_v43 = vrot.slane %v4442_v40, 5  ;;  %v1950_v54 = vrot.slane %v4465_v33, 4  ;;  %v1952_v60 = vrot.slane %v4424_v9, 3  ;;  %v1733_v49 = vpop.f32.mrf.mxu0 }
 0x182   :  { %v1805_v22 = vadd.f32 %v1804_v3, %v1803_v56  ;;  %v1856_v52 = vadd.f32 %v1855_v4, %v1854_v62  ;;  %v1954_v6 = vrot.slane %v4453_v16, 2  ;;  %v1757_v58 = vadd.f32 %v1730_v31, %v4382_v0 }
 0x183   :  { %v4534_v42 = vsel %vm1784_vm7, %v4525_v51, 0.0  ;;  %v1836_v13 = vmul.f32 %v4525_v51, %v4525_v51  ;;  %v1949_v15 = vsel %vm1915_vm11, %v1948_v43, %v1947_v11  ;;  %v1977_v46 = vrot.slane %v4417_v20, 1 }
 0x184   :  { %v1858_v17 = vadd.f32 %v1857_v45, %v1856_v52  ;;  %v1951_v48 = vsel %vm1918_vm12, %v1950_v54, %v1949_v15  ;;  %v4542_v3 = vadd.f32 %v4365_v23, %v1757_v58  ;;  %v1807_v14 = vadd.f32 %v1806_v12, %v1805_v22 }
 0x185   :  { %v4545_v0 = vsel %vm1784_vm7, %v1836_v13, 0.0  ;;  %v1953_v34 = vsel %vm1921_vm13, %v1952_v60, %v1951_v48  ;;  %v1978_v47 = vsel %vm1906_vm8, %v1977_v46, %v1976_v8  ;;  %v1982_v28 = vrot.slane %v4442_v40, 6 }
 0x186   :  { %v1955_v45 = vsel %vm1924_vm14, %v1954_v6, %v1953_v34  ;;  %v1808_v21 = vsel %vm1784_vm7, %v4542_v3, 0.0  ;;  %v1834_v10 = vmul.f32 %v4542_v3, %v4542_v3  ;;  %v1860_v41 = vadd.f32 %v1859_v39, %v1858_v17 }
 0x187   :  { %1970 = vrot.lane.b32.xlu1 %v1955_v45, %s3473_s3  ;;  %v1809_v55 = vadd.f32 %v1808_v21, %v1807_v14  ;;  %v1979_v26 = vsel %vm1909_vm9, %v4374_v32, %v1978_v47  ;;  %v1984_v29 = vrot.slane %v4465_v33, 5  ;;  %v1986_v8 = vrot.slane %v4424_v9, 4 }
 0x188   :  { %v1861_v12 = vsel %vm1784_vm7, %v1834_v10, 0.0  ;;  %v1981_v44 = vsel %vm1912_vm10, %v1980_v27, %v1979_v26  ;;  %v1988_v35 = vrot.slane %v4453_v16, 3  ;;  %v1760_v53 = vadd.f32 %v3300_v36, %v4384_v24 }
 0x189   :  { %v1862_v50 = vadd.f32 %v1861_v12, %v1860_v41  ;;  %v1983_v59 = vsel %vm1915_vm11, %v1982_v28, %v1981_v44  ;;  %v2011_v39 = vrot.slane %v4417_v20, 2  ;;  %v2016_v30 = vrot.slane %v4442_v40, 7 }
 0x18a   :  { %v1985_v25 = vsel %vm1918_vm12, %v1984_v29, %v1983_v59  ;;  %v4573_v7 = vadd.f32 %v4365_v23, %v1760_v53  ;;  %v2018_v31 = vrot.slane %v4465_v33, 6  ;;  %v2020_v27 = vrot.slane %v4424_v9, 5 }
 0x18b   :  { %v1987_v62 = vsel %vm1921_vm13, %v1986_v8, %v1985_v25  ;;  %v2012_v24 = vsel %vm1906_vm8, %v2011_v39, %v2010_v61  ;;  %v2022_v56 = vrot.slane %v4453_v16, 4  ;;  %v1758_v4 = vadd.f32 %v1733_v49, %v4386_v38 }
 0x18c   :  { %v1989_v11 = vsel %vm1924_vm14, %v1988_v35, %v1987_v62  ;;  %v1814_v43 = vsel %vm1784_vm7, %v4573_v7, 0.0  ;;  %v1837_v54 = vmul.f32 %v4573_v7, %v4573_v7  ;;  %v2014_v60 = vsel %vm1909_vm9, %v2013_v1, %v2012_v24 }
 0x18d   :  { %2004 = vrot.lane.b32.xlu0 %v1989_v11, %s3474_s15  ;;  %v2015_v61 = vsel %vm1912_vm10, %v4405_v5, %v2014_v60  ;;  %v4595_v38 = vadd.f32 %v4365_v23, %v1758_v4  ;;  %v2108_v22 = vrot.slane %v4393_v2, 6  ;;  %v2109_v52 = vrot.slane %v4417_v20, 5 }
 0x18e   :  { %v1867_v6 = vsel %vm1784_vm7, %v1837_v54, 0.0  ;;  %v2017_v58 = vsel %vm1915_vm11, %v2016_v30, %v2015_v61  ;;  %v2113_v13 = vrot.slane %v4405_v5, 3  ;;  %v2115_v1 = vrot.slane %v4442_v40, 2 }
 0x18f   :  { %v2019_v15 = vsel %vm1918_vm12, %v2018_v31, %v2017_v58  ;;  %v1810_v46 = vsel %vm1784_vm7, %v4595_v38, 0.0  ;;  %v1835_v23 = vmul.f32 %v4595_v38, %v4595_v38  ;;  %v2110_v17 = vsel %vm1906_vm8, %v2109_v52, %v2108_v22 }
 0x190   :  { %v2021_v48 = vsel %vm1921_vm13, %v2020_v27, %v2019_v15  ;;  %v1811_v14 = vadd.f32 %v1810_v46, %v1809_v55  ;;  %v2112_v36 = vsel %vm1909_vm9, %v2111_v18, %v2110_v17  ;;  %v2117_v34 = vrot.slane %v4465_v33, 1 }
 0x191   :  { %v2023_v47 = vsel %vm1924_vm14, %v2022_v56, %v2021_v48  ;;  %v1863_v28 = vsel %vm1784_vm7, %v1835_v23, 0.0  ;;  %v2114_v45 = vsel %vm1912_vm10, %v2113_v13, %v2112_v36  ;;  %v2120_v21 = vrot.slane %v4453_v16, 7 }
 0x192   :  { %2038 = vrot.lane.b32.xlu1 %v2023_v47, %s3475_s16  ;;  %v1813_v10 = vadd.f32 %v4534_v42, %v1811_v14  ;;  %v1864_v41 = vadd.f32 %v1863_v28, %v1862_v50  ;;  %v2116_v55 = vsel %vm1915_vm11, %v2115_v1, %v2114_v45  ;;  %v2088_v18 = vrot.slane %v4483_v37, 5 }
 0x193   :  { %v2118_v26 = vsel %vm1918_vm12, %v2117_v34, %v2116_v55  ;;  %v2089_v29 = vrot.slane %v4499_v19, 4  ;;  %v2091_v8 = vrot.slane %v4468_v63, 3  ;;  %v2093_v12 = vrot.slane %v4494_v57, 2 }
 0x194   :  { %v1815_v44 = vadd.f32 %v1814_v43, %v1813_v10  ;;  %v1866_v35 = vadd.f32 %v4545_v0, %v1864_v41  ;;  %v2119_v53 = vsel %vm1921_vm13, %v4424_v9, %v2118_v26  ;;  %v2095_v42 = vrot.slane %v4542_v3, 1 }
 0x195   :  { %v2121_v49 = vsel %vm1924_vm14, %v2120_v21, %v2119_v53  ;;  %v2090_v50 = vsel %vm1906_vm8, %v2089_v29, %v2088_v18  ;;  %v2098_v59 = vrot.slane %v4525_v51, 7  ;;  %v2100_v39 = vrot.slane %v4573_v7, 6 }
 0x196   :  { %v1816_v30 = vrot.slane %v1815_v44, 4  ;;  %v1868_v25 = vadd.f32 %v1867_v6, %v1866_v35  ;;  %2136 = vrot.lane.b32.xlu1 %v2121_v49, %s3474_s15  ;;  %v2092_v31 = vsel %vm1909_vm9, %v2091_v8, %v2090_v50  ;;  %v2024_v0 = vrot.slane %v4483_v37, 3 }
 0x197   :  { %v2094_v27 = vsel %vm1912_vm10, %v2093_v12, %v2092_v31  ;;  %v2025_v62 = vrot.slane %v4499_v19, 2  ;;  %v2027_v24 = vrot.slane %v4468_v63, 1  ;;  %v2030_v56 = vrot.slane %v4542_v3, 7 }
 0x198   :  { %v1817_v4 = vadd.f32 %v1816_v30, %v1815_v44  ;;  %v1869_v11 = vrot.slane %v1868_v25, 4  ;;  %v2096_v43 = vsel %vm1915_vm11, %v2095_v42, %v2094_v27  ;;  %v2032_v54 = vrot.slane %v4595_v38, 6 }
 0x199   :  { %v2097_v60 = vsel %vm1918_vm12, %v4595_v38, %v2096_v43  ;;  %v2026_v61 = vsel %vm1906_vm8, %v2025_v62, %v2024_v0  ;;  %v2034_v22 = vrot.slane %v4525_v51, 5  ;;  %v2036_v52 = vrot.slane %v4573_v7, 4 }
 0x19a   :  { %v1818_v6 = vrot.slane %v1817_v4, 2  ;;  %v1870_v58 = vadd.f32 %v1869_v11, %v1868_v25  ;;  %v2099_v13 = vsel %vm1921_vm13, %v2098_v59, %v2097_v60  ;;  %v2028_v1 = vsel %vm1909_vm9, %v2027_v24, %v2026_v61 }
 0x19b   :  { %v2101_v15 = vsel %vm1924_vm14, %v2100_v39, %v2099_v13  ;;  %v2029_v46 = vsel %vm1912_vm10, %v4494_v57, %v2028_v1  ;;  %v1956_v23 = vrot.slane %v4483_v37, 1  ;;  %v1958_v17 = vrot.slane %v4468_v63, 7 }
 0x19c   :  { %v1819_v48 = vadd.f32 %v1818_v6, %v1817_v4  ;;  %v1871_v14 = vrot.slane %v1870_v58, 2  ;;  %2104 = vrot.lane.b32.xlu1 %v2101_v15, %s3473_s3  ;;  %v2031_v36 = vsel %vm1915_vm11, %v2030_v56, %v2029_v46  ;;  %v1960_v34 = vrot.slane %v4494_v57, 6  ;;  %v1882_v4 = vld [vmem:[#allocation3] sm:$0x1] }
 0x19d   :  { %v2033_v47 = vsel %vm1918_vm12, %v2032_v54, %v2031_v36  ;;  %v1957_v28 = vsel %vm1906_vm8, %v4499_v19, %v1956_v23  ;;  %v1962_v45 = vrot.slane %v4542_v3, 5  ;;  %v1964_v21 = vrot.slane %v4595_v38, 4 }
 0x19e   :  { %v1820_v10 = vrot.slane %v1819_v48, 1  ;;  %v1872_v41 = vadd.f32 %v1871_v14, %v1870_v58  ;;  %v2035_v55 = vsel %vm1921_vm13, %v2034_v22, %v2033_v47  ;;  %v1959_v18 = vsel %vm1909_vm9, %v1958_v17, %v1957_v28  ;;  %v1886_v58 = vld [vmem:[#allocation4] sm:$0x1] }
 0x19f   :  { %v2037_v26 = vsel %vm1924_vm14, %v2036_v52, %v2035_v55  ;;  %v1961_v29 = vsel %vm1912_vm10, %v1960_v34, %v1959_v18  ;;  %v1966_v8 = vrot.slane %v4525_v51, 3  ;;  %v1968_v12 = vrot.slane %v4573_v7, 2 }
 0x1a0   :  { %v1821_v44 = vadd.f32 %v1820_v10, %v1819_v48  ;;  %v1873_v35 = vrot.slane %v1872_v41, 1  ;;  %2040 = vrot.lane.b32.xlu0 %v2037_v26, %s3475_s16  ;;  %v1963_v53 = vsel %vm1915_vm11, %v1962_v45, %v1961_v29  ;;  %v2122_v42 = vrot.slane %v4483_v37, 6 }
 0x1a1   :  { %v1965_v49 = vsel %vm1918_vm12, %v1964_v21, %v1963_v53  ;;  %v2123_v50 = vrot.slane %v4499_v19, 5  ;;  %v2125_v59 = vrot.slane %v4468_v63, 4  ;;  %v2127_v39 = vrot.slane %v4494_v57, 3 }
 0x1a2   :  { %v1967_v30 = vsel %vm1921_vm13, %v1966_v8, %v1965_v49  ;;  %v2129_v25 = vrot.slane %v4542_v3, 2  ;;  %v2131_v31 = vrot.slane %v4595_v38, 1  ;;  %v2134_v0 = vrot.slane %v4573_v7, 7 }
 0x1a3   :  { %v1969_v27 = vsel %vm1924_vm14, %v1968_v12, %v1967_v30  ;;  %v2124_v62 = vsel %vm1906_vm8, %v2123_v50, %v2122_v42  ;;  %v1990_v24 = vrot.slane %v4483_v37, 2  ;;  %v1991_v56 = vrot.slane %v4499_v19, 1 }
 0x1a4   :  { %1972 = vrot.lane.b32.xlu1 %v1969_v27, %s3473_s3  ;;  %v2126_v11 = vsel %vm1909_vm9, %v2125_v59, %v2124_v62  ;;  %v1994_v43 = vrot.slane %v4494_v57, 7  ;;  %v1996_v54 = vrot.slane %v4542_v3, 6  ;;  %v1998_v60 = vrot.slane %v4595_v38, 5 }
 0x1a5   :  { %v2128_v61 = vsel %vm1912_vm10, %v2127_v39, %v2126_v11  ;;  %v1992_v22 = vsel %vm1906_vm8, %v1991_v56, %v1990_v24  ;;  %v2000_v52 = vrot.slane %v4525_v51, 4  ;;  %v2002_v6 = vrot.slane %v4573_v7, 3 }
 0x1a6   :  { %v2130_v13 = vsel %vm1915_vm11, %v2129_v25, %v2128_v61  ;;  %v1993_v1 = vsel %vm1909_vm9, %v4468_v63, %v1992_v22  ;;  %v1874_v15 = vadd.f32 %v1873_v35, %v1872_v41  ;;  %v1883_v46 = vadd.f32 %v1882_v4, %v1821_v44 }
 0x1a7   :  { %v2132_v23 = vsel %vm1918_vm12, %v2131_v31, %v2130_v13  ;;  %v1995_v17 = vsel %vm1912_vm10, %v1994_v43, %v1993_v1  ;;  %v2156_v48 = vrot.slane %v4483_v37, 7  ;;  %v2157_v14 = vrot.slane %v4499_v19, 6 }
 0x1a8   :  { %v2133_v36 = vsel %vm1921_vm13, %v4525_v51, %v2132_v23  ;;  %v1997_v34 = vsel %vm1915_vm11, %v1996_v54, %v1995_v17  ;;  %1885 = vst.msk [vmem:[#allocation3] sm:$0x1] %vm1879_vm6, %v1883_v46  ;;  %v1887_v47 = vadd.f32 %v1886_v58, %v1874_v15  ;;  %v2159_v28 = vrot.slane %v4468_v63, 5 }
 0x1a9   :  { %v2135_v45 = vsel %vm1924_vm14, %v2134_v0, %v2133_v36  ;;  %v1999_v21 = vsel %vm1918_vm12, %v1998_v60, %v1997_v34  ;;  %v2158_v10 = vsel %vm1906_vm8, %v2157_v14, %v2156_v48  ;;  %v2161_v41 = vrot.slane %v4494_v57, 4 }
 0x1aa   :  { %2138 = vrot.lane.b32.xlu0 %v2135_v45, %s3474_s15  ;;  %v2001_v55 = vsel %vm1921_vm13, %v2000_v52, %v1999_v21  ;;  %1888 = vst.msk [vmem:[#allocation4] sm:$0x1] %vm1879_vm6, %v1887_v47  ;;  %v2160_v18 = vsel %vm1909_vm9, %v2159_v28, %v2158_v10  ;;  %v2163_v26 = vrot.slane %v4542_v3, 3  ;;  %v2165_v29 = vrot.slane %v4595_v38, 2 }
 0x1ab   :  { %v2003_v8 = vsel %vm1924_vm14, %v2002_v6, %v2001_v55  ;;  %v2162_v12 = vsel %vm1912_vm10, %v2161_v41, %v2160_v18  ;;  %v2167_v35 = vrot.slane %v4525_v51, 1  ;;  %v2142_v53 = vrot.slane %v4393_v2, 7 }
 0x1ac   :  { %2006 = vrot.lane.b32.xlu1 %v2003_v8, %s3474_s15  ;;  %v2164_v44 = vsel %vm1915_vm11, %v2163_v26, %v2162_v12  ;;  %v2143_v42 = vrot.slane %v4417_v20, 6  ;;  %v2145_v50 = vrot.slane %v4374_v32, 5  ;;  %v2147_v59 = vrot.slane %v4405_v5, 4 }
 0x1ad   :  { %v2166_v49 = vsel %vm1918_vm12, %v2165_v29, %v2164_v44  ;;  %v2149_v39 = vrot.slane %v4442_v40, 3  ;;  %v2151_v31 = vrot.slane %v4465_v33, 2  ;;  %v2153_v0 = vrot.slane %v4424_v9, 1 }
 0x1ae   :  { %v2168_v30 = vsel %vm1921_vm13, %v2167_v35, %v2166_v49  ;;  %v2144_v25 = vsel %vm1906_vm8, %v2143_v42, %v2142_v53  ;;  %v2045_v56 = vrot.slane %v4417_v20, 3  ;;  %v2047_v4 = vrot.slane %v4374_v32, 2 }
 0x1af   :  { %v2203_v27 = vld [vmem:[#allocation3] sm:$0x1]  ;;  %v4732_v62 = vsel %vm1924_vm14, %v4573_v7, %v2168_v30  ;;  %v2146_v24 = vsel %vm1909_vm9, %v2145_v50, %v2144_v25  ;;  %v2049_v54 = vrot.slane %v4405_v5, 1  ;;  %v2052_v60 = vrot.slane %v4465_v33, 7 }
 0x1b0   :  { %v4737_v11 = vmul.f32 0.0078125, %v2203_v27  ;;  %v2148_v43 = vsel %vm1912_vm10, %v2147_v59, %v2146_v24  ;;  %v2054_v52 = vrot.slane %v4424_v9, 6  ;;  %v2044_v6 = vrot.slane %v4393_v2, 4 }
 0x1b1   :  { %v2206_v61 = vld [vmem:[#allocation4] sm:$0x1]  ;;  %v2150_v22 = vsel %vm1915_vm11, %v2149_v39, %v2148_v43  ;;  %v1905_v58 = vrot.slane %v4417_v20, 7  ;;  %v2056_v46 = vrot.slane %v4453_v16, 5  ;;  %v1908_v48 = vrot.slane %v4374_v32, 6 }
 0x1b2   :  { %v2207_v13 = vmul.f32 0.0078125, %v2206_v61  ;;  %v2208_v1 = vmul.f32 %v4737_v11, %v4737_v11  ;;  %v2152_v15 = vsel %vm1918_vm12, %v2151_v31, %v2150_v22  ;;  %v2046_v17 = vsel %vm1906_vm8, %v2045_v56, %v2044_v6 }
 0x1b3   :  { %v2154_v23 = vsel %vm1921_vm13, %v2153_v0, %v2152_v15  ;;  %v1911_v14 = vrot.slane %v4405_v5, 5  ;;  %v2048_v34 = vsel %vm1909_vm9, %v2047_v4, %v2046_v17  ;;  %v1914_v47 = vrot.slane %v4442_v40, 4 }
 0x1b4   :  { %v2209_v36 = vsub.f32 %v2207_v13, %v2208_v1  ;;  %v4756_v20 = vsel %vm1924_vm14, %v4453_v16, %v2154_v23  ;;  %v2050_v28 = vsel %vm1912_vm10, %v2049_v54, %v2048_v34  ;;  %v1917_v45 = vrot.slane %v4465_v33, 3 }
 0x1b5   :  { %v1920_v21 = vrot.slane %v4424_v9, 2  ;;  %v1907_v32 = vsel %vm1906_vm8, %v1905_v58, %v4393_v2  ;;  %v2051_v5 = vsel %vm1915_vm11, %v4442_v40, %v2050_v28  ;;  %v1923_v41 = vrot.slane %v4453_v16, 1 }
 0x1b6   :  { %v2210_v10 = vmax.f32 %v2209_v36, 0.0  ;;  %v1910_v55 = vsel %vm1909_vm9, %v1908_v48, %v1907_v32  ;;  %v2053_v18 = vsel %vm1918_vm12, %v2052_v60, %v2051_v5  ;;  %v2058_v29 = vrot.slane %v4483_v37, 4 }
 0x1b7   :  { %v1913_v26 = vsel %vm1912_vm10, %v1911_v14, %v1910_v55  ;;  %v2059_v33 = vrot.slane %v4499_v19, 3  ;;  %v2055_v8 = vsel %vm1921_vm13, %v2054_v52, %v2053_v18  ;;  %v2061_v12 = vrot.slane %v4468_v63, 2 }
 0x1b8   :  { %v2212_v9 = vadd.f32 1e-05, %v2210_v10  ;;  %v1916_v2 = vsel %vm1915_vm11, %v1914_v47, %v1913_v26  ;;  %v4777_v40 = vsel %vm1924_vm14, %v2056_v46, %v2055_v8  ;;  %v2063_v35 = vrot.slane %v4494_v57, 1 }
 0x1b9   :  { %v1919_v16 = vsel %vm1918_vm12, %v1917_v45, %v1916_v2  ;;  %v2060_v44 = vsel %vm1906_vm8, %v2059_v33, %v2058_v29  ;;  %v2066_v49 = vrot.slane %v4595_v38, 7  ;;  %v2219_v39 = vlaneseq }
 0x1ba   :  { %3470 = vrsqrt.f32 %v2212_v9  ;;  %v1922_v53 = vsel %vm1921_vm13, %v1920_v21, %v1919_v16  ;;  %v2062_v42 = vsel %vm1909_vm9, %v2061_v12, %v2060_v44  ;;  %v2068_v25 = vrot.slane %v4525_v51, 6 }
 0x1bb   :  { %v1925_v50 = vsel %vm1924_vm14, %v1923_v41, %v1922_v53  ;;  %v2064_v59 = vsel %vm1912_vm10, %v2063_v35, %v2062_v42  ;;  %v1926_v31 = vrot.slane %v4499_v19, 7  ;;  %v2070_v27 = vrot.slane %v4573_v7, 5 }
 0x1bc   :  { %v2065_v30 = vsel %vm1915_vm11, %v4542_v3, %v2064_v59  ;;  %v1928_v24 = vrot.slane %v4468_v63, 6  ;;  %v1932_v56 = vrot.slane %v4542_v3, 4  ;;  %v1930_v54 = vrot.slane %v4494_v57, 5 }
 0x1bd   :  { %v2067_v0 = vsel %vm1918_vm12, %v2066_v49, %v2065_v30  ;;  %v1927_v43 = vsel %vm1906_vm8, %v1926_v31, %v4483_v37  ;;  %v1934_v60 = vrot.slane %v4595_v38, 3  ;;  %v1936_v63 = vrot.slane %v4525_v51, 2  ;;  %v2211_v38 = vld [vmem:[%s4994_s4] sm:$0x1] }
 0x1be   :  { %v2069_v4 = vsel %vm1921_vm13, %v2068_v25, %v2067_v0  ;;  %v1929_v19 = vsel %vm1909_vm9, %v1928_v24, %v1927_v43  ;;  %v2220_v3 = vshrl.u32 %v2219_v39, 7  ;;  %v1938_v58 = vrot.slane %v4573_v7, 1  ;;  %v2215_v51 = vld [vmem:[%s4995_s5] sm:$0x1] }
 0x1bf   :  { %v2071_v61 = vsel %vm1924_vm14, %v2070_v27, %v2069_v4  ;;  %v1931_v22 = vsel %vm1912_vm10, %v1930_v54, %v1929_v19 }
 0x1c0   :  { %v1933_v52 = vsel %vm1915_vm11, %v1932_v56, %v1931_v22  ;;  %v2221_v13 = vsub.s32 0, %v2220_v3 }
 0x1c1   :  { %v1935_v6 = vsel %vm1918_vm12, %v1934_v60, %v1933_v52 }
 0x1c2   :  { %v1937_v37 = vsel %vm1921_vm13, %v1936_v63, %v1935_v6 }
 0x1c3   :  { %v1939_v57 = vsel %vm1924_vm14, %v1938_v58, %v1937_v37 }
 0x1c7   :  { %v3471_v1 = vpop.eup %3470 }
 0x1c8   :  { %v2214_v15 = vmul.f32 %v3471_v1, %v2211_v38 }
 0x1ca   :  { %v2222_v46 = vrot.slane %v2214_v15, %v2221_v13  ;;  %v2216_v23 = vmul.f32 %v2214_v15, %v4737_v11 }
 0x1cc   :  { %2223 = vrot.lane.b32.xlu0 %v2222_v46, %s3473_s3  ;;  %v2217_v7 = vsub.f32 %v2215_v51, %v2216_v23  ;;  %v3439_v23 = vld [vmem:[%s4996_s6 + $0x38] sm:$0xff]  }
 0x1ce   :  { %v2239_v17 = vrot.slane %v2217_v7, %v2221_v13 }
 0x1d0   :  { %2226 = vrot.lane.b32.xlu0 %v2222_v46, %s3474_s15  ;;  %2240 = vrot.lane.b32.xlu1 %v2239_v17, %s3473_s3 }
 0x1d4   :  { %2229 = vrot.lane.b32.xlu0 %v2222_v46, %s3475_s16  ;;  %2246 = vrot.lane.b32.xlu1 %v2239_v17, %s3475_s16  ;;  %v3438_v46 = vld [vmem:[%s4996_s6 + $0x78] sm:$0xff]  }
 0x1d5   :  { %3225 = vmatprep.subr.bf16.mxu1 %v3438_v46 }
 0x1d6   :  { %3226 = vmatpush3.bf16.msra.mxu1 %v3439_v23 }
 0x1d8   :  { %2243 = vrot.lane.b32.xlu0 %v2239_v17, %s3474_s15  ;;  %2172 = vrot.lane.b32.xlu1 %v4732_v62, %s3475_s16  ;;  %v3441_v17 = vld [vmem:[%s4996_s6 + $0x30] sm:$0xff]  }
 0x1dc   :  { %2170 = vrot.lane.b32.xlu0 %v4756_v20, %s3475_s16 }
 0x1f2   :  { %v2103_v14 = vpop.permute.xlu0 %2102 }
 0x1f3   :  { %v2184_v25 = vsel %vm1784_vm7, %v4777_v40, %v2103_v14  ;;  %v3444_v14 = vld [vmem:[%s4996_s6 + $0x60] sm:$0xff]  }
 0x1f9   :  { %v1971_v11 = vpop.permute.xlu1 %1970 }
 0x1fa   :  { %v2176_v62 = vsel %vm1784_vm7, %v1925_v50, %v1971_v11  ;;  %v3442_v11 = vld [vmem:[%s4996_s6 + $0x68] sm:$0xff]  }
 0x1ff   :  { %v2005_v34 = vpop.permute.xlu0 %2004 }
 0x200   :  { %v2179_v9 = vsel %vm2178_vm15, %v2176_v62, %v2005_v34  ;;  %v3446_v34 = vld [vmem:[%s4996_s6 + $0x58] sm:$0xff]   ;;  %v3456_v62 = vld [vmem:[%s4996_s6 + $0xe0] sm:$0xff]  }
 0x204   :  { %v2039_v48 = vpop.permute.xlu1 %2038 }
 0x205   :  { %v2182_v50 = vsel %vm2181_vm0, %v2179_v9, %v2039_v48  ;;  %v3443_v48 = vld [vmem:[%s4996_s6 + $0x28] sm:$0xff]  }
 0x208   :  { %v2137_v36 = vpop.permute.xlu1 %2136 }
 0x209   :  { %v2186_v24 = vsel %vm2178_vm15, %v2184_v25, %v2137_v36  ;;  %v3445_v36 = vld [vmem:[%s4996_s6 + $0x20] sm:$0xff]  }
 0x20e   :  { %v2105_v47 = vpop.permute.xlu1 %2104 }
 0x20f   :  { %v2185_v8 = vsel %vm1784_vm7, %v2071_v61, %v2105_v47  ;;  %v3448_v47 = vld [vmem:[%s4996_s6 + $0xf8] sm:$0xff]  }
 0x210   :  { %3247 = vmatprep.subr.bf16.mxu0 %v3448_v47 }
 0x212   :  { %v2041_v28 = vpop.permute.xlu0 %2040 }
 0x216   :  { %v1973_v45 = vpop.permute.xlu1 %1972 }
 0x217   :  { %v2177_v33 = vsel %vm1784_vm7, %v1939_v57, %v1973_v45  ;;  %v3450_v45 = vld [vmem:[%s4996_s6 + $0xf0] sm:$0xff]  }
 0x21c   :  { %v2139_v21 = vpop.permute.xlu0 %2138 }
 0x21d   :  { %v2187_v16 = vsel %vm2178_vm15, %v2185_v8, %v2139_v21  ;;  %v3451_v21 = vld [vmem:[%s4996_s6 + $0xb0] sm:$0xff]  }
 0x21e   :  { %v2007_v32 = vpop.permute.xlu1 %2006 }
 0x21f   :  { %v2180_v2 = vsel %vm2178_vm15, %v2177_v33, %v2007_v32  ;;  %v3447_v32 = vld [vmem:[%s4996_s6 + $0x18] sm:$0xff]  }
 0x220   :  { %v2183_v59 = vsel %vm2181_vm0, %v2180_v2, %v2041_v28  ;;  %v3449_v28 = vld [vmem:[%s4996_s6 + $0xb8] sm:$0xff]  }
 0x221   :  { %3248 = vmatpush3.bf16.msra.mxu0 %v3449_v28  ;;  %v3461_v33 = vld [vmem:[%s4996_s6 + $0x98] sm:$0xff]  }
 0x222   :  { %3249 = vmatprep.subr.bf16.mxu0 %v3450_v45 }
 0x225   :  { %3250 = vmatpush3.bf16.msra.mxu0 %v3451_v21 }
 0x23e   :  { %v2224_v10 = vpop.permute.xlu0 %2223 }
 0x23f   :  { %v2232_v55 = vsel %vm1784_vm7, %v2214_v15, %v2224_v10  ;;  %v3452_v10 = vld [vmem:[%s4996_s6 + $0x50] sm:$0xff]  }
 0x242   :  { %v2227_v5 = vpop.permute.xlu0 %2226  ;;  %v2241_v41 = vpop.permute.xlu1 %2240 }
 0x243   :  { %v2233_v20 = vsel %vm2178_vm15, %v2232_v55, %v2227_v5  ;;  %v2249_v44 = vsel %vm1784_vm7, %v2217_v7, %v2241_v41  ;;  %v3440_v7 = vld [vmem:[%s4996_s6 + $0x70] sm:$0xff]   ;;  %v3454_v5 = vld [vmem:[%s4996_s6 + $0xe8] sm:$0xff]  }
 0x244   :  { %3227 = vmatprep.subr.bf16.mxu1 %v3440_v7  ;;  %v3453_v41 = vld [vmem:[%s4996_s6 + $0x10] sm:$0xff]   ;;  %v3455_v55 = vld [vmem:[%s4996_s6 + $0xa8] sm:$0xff]   ;;  %3251 = vmatprep.subr.bf16.mxu0 %v3454_v5 }
 0x245   :  { %3228 = vmatpush3.bf16.msra.mxu1 %v3441_v17  ;;  %3252 = vmatpush3.bf16.msra.mxu0 %v3455_v55 }
 0x246   :  { %v2230_v18 = vpop.permute.xlu0 %2229  ;;  %v2247_v26 = vpop.permute.xlu1 %2246  ;;  %3229 = vmatprep.subr.bf16.mxu1 %v3442_v11  ;;  %3253 = vmatprep.subr.bf16.mxu0 %v3456_v62 }
 0x247   :  { %v2234_v29 = vsel %vm2181_vm0, %v2233_v20, %v2230_v18  ;;  %v3457_v20 = vld [vmem:[%s4996_s6 + $0xa0] sm:$0xff]   ;;  %v3458_v18 = vld [vmem:[%s4996_s6 + $0x48] sm:$0xff]  }
 0x248   :  { %v2326_v12 = vrot.slane %v2234_v29, %v2221_v13  ;;  %v3460_v29 = vld [vmem:[%s4996_s6 + $0xd8] sm:$0xff]  }
 0x249   :  { %3230 = vmatpush3.bf16.msra.mxu1 %v3443_v48  ;;  %3254 = vmatpush3.bf16.msra.mxu0 %v3457_v20 }
 0x24a   :  { %v2244_v35 = vpop.permute.xlu0 %2243  ;;  %v2173_v53 = vpop.permute.xlu1 %2172  ;;  %v2327_v0 = vmul.f32 %v2326_v12, %v2182_v50  ;;  %v2329_v27 = vmul.f32 %v2326_v12, %v2183_v59  ;;  %3231 = vmatprep.subr.bf16.mxu1 %v3444_v14  ;;  %3255 = vmatprep.subr.bf16.mxu0 %v3460_v29  ;;  %v3464_v50 = vld [vmem:[%s4996_s6 + $0x90] sm:$0xff]  }
 0x24b   :  { %v2250_v42 = vsel %vm2178_vm15, %v2249_v44, %v2244_v35  ;;  %v2189_v49 = vsel %vm2181_vm0, %v2187_v16, %v2173_v53 }
 0x24c   :  { %v2251_v39 = vsel %vm2181_vm0, %v2250_v42, %v2247_v26  ;;  %v2330_v30 = vmul.f32 %v2326_v12, %v2189_v49  ;;  %v3459_v26 = vld [vmem:[%s4996_s6 + $0x8] sm:$0xff]   ;;  %v3462_v42 = vld [vmem:[%s4996_s6 + $0xd0] sm:$0xff]   ;;  %v3463_v49 = vld [vmem:[%s4996_s6 + $0x40] sm:$0xff]  }
 0x24d   :  { %v2334_v31 = vrot.slane %v2251_v39, %v2221_v13  ;;  %3232 = vmatpush3.bf16.msra.mxu1 %v3445_v36  ;;  %3256 = vmatpush3.bf16.msra.mxu0 %v3461_v33 }
 0x24e   :  { %v2171_v56 = vpop.permute.xlu0 %2170  ;;  %3233 = vmatprep.subr.bf16.mxu1 %v3446_v34  ;;  %3257 = vmatprep.subr.bf16.mxu0 %v3462_v42 }
 0x24f   :  { %v2338_v4 = vadd.f32 %v2334_v31, %v2330_v30  ;;  %v2188_v43 = vsel %vm2181_vm0, %v2186_v24, %v2171_v56  ;;  %v2335_v54 = vadd.f32 %v2334_v31, %v2327_v0  ;;  %v2337_v60 = vadd.f32 %v2334_v31, %v2329_v27  ;;  %v3465_v24 = vld [vmem:[%s4996_s6] sm:$0xff]  }
 0x250   :  { %v2328_v61 = vmul.f32 %v2326_v12, %v2188_v43 }
 0x251   :  { %v2342_v19 = vmax.f32 %v2338_v4, 0.0  ;;  %v2339_v22 = vmax.f32 %v2335_v54, 0.0  ;;  %v2341_v52 = vmax.f32 %v2337_v60, 0.0  ;;  %3234 = vmatpush3.bf16.msra.mxu1 %v3447_v32  ;;  %3258 = vmatpush3.bf16.msra.mxu0 %v3464_v50  ;;  %v3466_v60 = vld [vmem:[%s4996_s6 + $0xc8] sm:$0xff]  }
 0x252   :  { %v2336_v63 = vadd.f32 %v2334_v31, %v2328_v61  ;;  %3235 = vmatprep.subr.bf16.mxu1 %v3452_v10  ;;  %v3467_v61 = vld [vmem:[%s4996_s6 + $0x88] sm:$0xff]   ;;  %3259 = vmatprep.subr.bf16.mxu0 %v3466_v60 }
 0x253   :  { %v2347_v3 = vrot.slane %v2339_v22, 1  ;;  %v2349_v6 = vrot.slane %v2341_v52, 1  ;;  %v2350_v58 = vrot.slane %v2342_v19, 1 }
 0x254   :  { %v2340_v40 = vmax.f32 %v2336_v63, 0.0 }
 0x255   :  { %v2355_v37 = vmax.f32 %v2339_v22, %v2347_v3  ;;  %v2357_v57 = vmax.f32 %v2341_v52, %v2349_v6  ;;  %v4847_v15 = vmax.f32 %v2342_v19, %v2350_v58  ;;  %3236 = vmatpush3.bf16.msra.mxu1 %v3453_v41  ;;  %3260 = vmatpush3.bf16.msra.mxu0 %v3467_v61 }
 0x256   :  { %v2348_v38 = vrot.slane %v2340_v40, 1  ;;  %3237 = vmatprep.subr.bf16.mxu1 %v3458_v18 }
 0x257   :  { %v3306_v13 = vpack.i.bf16 %v2357_v57, %v2355_v37 }
 0x258   :  { %v4845_v1 = vmax.f32 %v2340_v40, %v2348_v38 }
 0x259   :  { %3307 = vrot.lane.b32.xlu0 %v3306_v13, %s3475_s16  ;;  %3238 = vmatpush3.bf16.msra.mxu1 %v3459_v26  ;;  %v3468_v13 = vld [vmem:[%s4996_s6 + $0xc0] sm:$0xff]  }
 0x25a   :  { %v3311_v51 = vpack.i.bf16 %v4847_v15, %v4845_v1  ;;  %3239 = vmatprep.subr.bf16.mxu1 %v3463_v49  ;;  %3261 = vmatprep.subr.bf16.mxu0 %v3468_v13 }
 0x25c   :  { %3312 = vrot.lane.b32.xlu1 %v3311_v51, %s3475_s16 }
 0x25d   :  { %3240 = vmatpush3.bf16.msra.mxu1 %v3465_v24 }
 0x2cb   :  { %v3308_v9 = vpop.permute.xlu0 %3307 }
 0x2cc   :  { %v3310_v8 = vunpack.i.h.bf16 %v3308_v9  ;;  %v3309_v2 = vunpack.i.l.bf16 %v3308_v9 }
 0x2ce   :  { %v2368_v12 = vmax.f32 %v2357_v57, %v3310_v8  ;;  %v2367_v16 = vmax.f32 %v2355_v37, %v3309_v2  ;;  %v3313_v44 = vpop.permute.xlu1 %3312 }
 0x2cf   :  { %v3315_v35 = vunpack.i.h.bf16 %v3313_v44  ;;  %v3314_v53 = vunpack.i.l.bf16 %v3313_v44 }
 0x2d0   :  { %v2381_v59 = vrot.slane %v2368_v12, 7  ;;  %v2397_v39 = vrot.slane %v2367_v16, 2  ;;  %v2398_v30 = vrot.slane %v2368_v12, 1  ;;  %v2413_v0 = vrot.slane %v2367_v16, 4 }
 0x2d1   :  { %v2378_v25 = vmax.f32 %v4847_v15, %v3315_v35  ;;  %v2377_v31 = vmax.f32 %v4845_v1, %v3314_v53  ;;  %v2414_v27 = vrot.slane %v2368_v12, 3  ;;  %v2429_v43 = vrot.slane %v2367_v16, 6  ;;  %v3469_v1 = vld [vmem:[%s4996_s6 + $0x80] sm:$0xff]  }
 0x2d2   :  { %v2382_v56 = vsel %vm1906_vm8, %v2381_v59, %v2367_v16  ;;  %v2399_v4 = vsel %vm1906_vm8, %v2398_v30, %v2397_v39  ;;  %v2430_v54 = vrot.slane %v2368_v12, 5  ;;  %3262 = vmatpush3.bf16.msra.mxu0 %v3469_v1 }
 0x2d3   :  { %v3316_v19 = vpack.i.bf16 %v2382_v56, %v2399_v4  ;;  %v2389_v22 = vrot.slane %v2378_v25, 7  ;;  %v2404_v52 = vrot.slane %v2377_v31, 2  ;;  %v2405_v63 = vrot.slane %v2378_v25, 1 }
 0x2d4   :  { %v2420_v3 = vrot.slane %v2377_v31, 4  ;;  %v2421_v6 = vrot.slane %v2378_v25, 3  ;;  %v2436_v37 = vrot.slane %v2377_v31, 6  ;;  %v2437_v38 = vrot.slane %v2378_v25, 5 }
 0x2d5   :  { %3317 = vrot.lane.b32.xlu0 %v3316_v19, %s3475_s16  ;;  %v2390_v58 = vsel %vm1906_vm8, %v2389_v22, %v2377_v31  ;;  %v2406_v40 = vsel %vm1906_vm8, %v2405_v63, %v2404_v52  ;;  %v2415_v15 = vsel %vm1906_vm8, %v2414_v27, %v2413_v0  ;;  %v2431_v51 = vsel %vm1906_vm8, %v2430_v54, %v2429_v43  ;;  %v2951_v63 = vld [vmem:[%s4999_s8] ss:$0 sm:$0xff] }
 0x2d6   :  { %v3321_v57 = vpack.i.bf16 %v2390_v58, %v2406_v40  ;;  %v2422_v46 = vsel %vm1906_vm8, %v2421_v6, %v2420_v3  ;;  %v2438_v23 = vsel %vm1906_vm8, %v2437_v38, %v2436_v37  ;;  %v3331_v7 = vpack.i.bf16 %v2415_v15, %v2431_v51 }
 0x2d7   :  { %v3336_v17 = vpack.i.bf16 %v2422_v46, %v2438_v23  ;;  %v15_v25 = vstv %s4997_s9  ;;  %v3476_v40 = vmov 0  }
 0x2d8   :  { %3322 = vrot.lane.b32.xlu1 %v3321_v57, %s3474_s15  ;;  %16 = vst [vmem:[#allocation5] sm:$0x1] %v15_v25  ;;  %3347 = vset.pattern.permute.xlu0 %v3476_v40 }
 0x2d9   :  { %3327 = vrot.lane.b32.xlu0 %v3321_v57, %s3473_s3  ;;  %3346 = vset.pattern.permute.xlu1 %v3476_v40 }
 0x2dc   :  { %3332 = vrot.lane.b32.xlu1 %v3331_v7, %s3475_s16 }
 0x2dd   :  { %3337 = vrot.lane.b32.xlu0 %v3336_v17, %s3474_s15 }
 0x2df   :  { %v2952_v37 = vld [vmem:[#allocation5] ss:$0 sm:$0xff] }
 0x2e0   :  { %3342 = vrot.lane.b32.xlu1 %v3336_v17, %s3473_s3 }
 0x347   :  { %v3318_v11 = vpop.permute.xlu0 %3317 }
 0x348   :  { %v3320_v48 = vunpack.i.h.bf16 %v3318_v11  ;;  %v3319_v14 = vunpack.i.l.bf16 %v3318_v11 }
 0x34a   :  { %v3323_v36 = vpop.permute.xlu1 %3322  ;;  %v2445_v45 = vsel %vm1784_vm7, %v2382_v56, %v3320_v48  ;;  %v2448_v21 = vsel %vm1784_vm7, %v2399_v4, %v3319_v14  ;;  %v2918_v4 = vld [vmem:[%s4998_s7] ss:$0 sm:$0xff] }
 0x34b   :  { %v3325_v34 = vunpack.i.h.bf16 %v3323_v36  ;;  %v3324_v47 = vunpack.i.l.bf16 %v3323_v36  ;;  %v3328_v28 = vpop.permute.xlu0 %3327 }
 0x34c   :  { %v3330_v32 = vunpack.i.h.bf16 %v3328_v28  ;;  %v3329_v10 = vunpack.i.l.bf16 %v3328_v28 }
 0x34d   :  { %v2446_v5 = vsel %vm2178_vm15, %v2445_v45, %v3325_v34  ;;  %v2449_v41 = vsel %vm2178_vm15, %v2448_v21, %v3324_v47 }
 0x34e   :  { %v2447_v55 = vsel %vm2181_vm0, %v2446_v5, %v3330_v32  ;;  %v3333_v62 = vpop.permute.xlu1 %3332  ;;  %v2450_v20 = vsel %vm2181_vm0, %v2449_v41, %v3329_v10 }
 0x34f   :  { %v2457_v18 = vpack.c.bf16 %v2447_v55, %v2447_v55  ;;  %v3335_v26 = vunpack.i.h.bf16 %v3333_v62  ;;  %v3334_v29 = vunpack.i.l.bf16 %v3333_v62  ;;  %v3338_v33 = vpop.permute.xlu0 %3337  ;;  %v2458_v9 = vpack.c.bf16 %v2450_v20, %v2450_v20 }
 0x350   :  { %v3340_v8 = vunpack.i.h.bf16 %v3338_v33  ;;  %v3339_v2 = vunpack.i.l.bf16 %v3338_v33 }
 0x351   :  { %v2451_v12 = vsel %vm1784_vm7, %v2415_v15, %v3335_v26  ;;  %v2454_v16 = vsel %vm1784_vm7, %v2431_v51, %v3334_v29  ;;  %2691 = vmatprep.mubr.bf16.mxu1 %v2458_v9 }
 0x352   :  { %v3343_v44 = vpop.permute.xlu1 %3342  ;;  %2692 = vmatmul.mubr.bf16.vlgmr.msra.gmra.mxu1 %v2457_v18  ;;  %v2452_v42 = vsel %vm2178_vm15, %v2451_v12, %v3340_v8  ;;  %v2455_v49 = vsel %vm2178_vm15, %v2454_v16, %v3339_v2 }
 0x353   :  { %v3345_v35 = vunpack.i.h.bf16 %v3343_v44  ;;  %v3344_v53 = vunpack.i.l.bf16 %v3343_v44 }
 0x355   :  { %v2453_v50 = vsel %vm2181_vm0, %v2452_v42, %v3345_v35  ;;  %v2456_v59 = vsel %vm2181_vm0, %v2455_v49, %v3344_v53 }
 0x356   :  { %v2459_v39 = vpack.c.bf16 %v2453_v50, %v2453_v50  ;;  %v2460_v30 = vpack.c.bf16 %v2456_v59, %v2456_v59 }
 0x358   :  { %2731 = vmatprep.mubr.bf16.mxu0 %v2460_v30 }
 0x359   :  { %2732 = vmatmul.mubr.bf16.vlgmr.msra.gmra.mxu0 %v2459_v39 }
 0x412   :  { %v3241_v31 = vpop.f32.mrf.mxu1 }
 0x414   :  { %v3242_v0 = vpop.f32.mrf.mxu1 }
 0x415   :  { %v3243_v24 = vadd.f32 %v3242_v0, %v3241_v31 }
 0x416   :  { %v3244_v27 = vpop.f32.mrf.mxu1 }
 0x417   :  { %v2694_v60 = vadd.f32 %v3243_v24, %v2918_v4 }
 0x418   :  { %v3245_v56 = vpop.f32.mrf.mxu1 }
 0x419   :  { %v3263_v43 = vpop.f32.mrf.mxu0 }
 0x41b   :  { %v3264_v54 = vpop.f32.mrf.mxu0 }
 0x41c   :  { %v3265_v61 = vadd.f32 %v3264_v54, %v3263_v43 }
 0x41d   :  { %v3266_v19 = vpop.f32.mrf.mxu0 }
 0x41e   :  { %v2734_v22 = vadd.f32 %v3265_v61, %v2694_v60 }
 0x41f   :  { %v3267_v52 = vpop.f32.mrf.mxu0 }
 0x420   :  { %v2739_v3 = vmax.f32 %v2734_v22, 0.0 }
 0x422   :  { %v2746_v6 = vmul.f32 %v2951_v63, %v2739_v3 }
 0x424   :  { %v2748_v58 = vsel %vm2747_vm1, %v2746_v6, 0.0 }
 0x425   :  { %2749 = vadd.xlane.f32.xlu0 %v2748_v58 }
 0x4ae   :  { %v2750_v57 = vpop.xlane.xlu0 %2749 }
 0x4af   :  { %v2757_v38 = vadd.f32 %v2952_v37, %v2750_v57 }
 0x4b1   :  { %2760 = vperm.xlu1 %3346, %v2757_v38  }
 0x52c   :  { %v2761_v13 = vpop.permute.xlu1 %2760 }
 0x52d   :  { %v2763_v1 = vsel %vm2178_vm15, %v2739_v3, %v2761_v13 }
 0x52e   :  { %2764 = vst [vmem:[%s5000_s10] sm:$0x3] %v2763_v1 }

</bundles_post_ra>
